<compile_context>
chip_gen: v7x
topology: tpu7x:2x2x1
jax: 0.10.0
libtpu: 0.0.40
codegen_flags: <defaults>
</compile_context>

<pallas_src>
import functools

import jax
import jax.numpy as jnp
from jax.experimental import pallas as pl
from jax.experimental.pallas import tpu as pltpu


def _round_up(v, m):
    return ((v + m - 1) // m) * m


def _resident_spec(shape):
    """Grid-invariant operand: constant index_map + a single VMEM buffer
    (no double-buffering for a block that never changes across the grid)."""
    nd = len(shape)
    return pl.BlockSpec(shape, lambda *_: (0,) * nd,
                        pipeline_mode=pl.Buffered(1))


def _vmem_limit(nbytes):
    """Scoped-VMEM budget: operand bytes + pipeline/internal headroom."""
    return int(min(max(int(nbytes * 1.25) + (2 << 20), 16 << 20), 100 << 20))


def _masked_log_softmax(z, num_classes):
    """LogSoftmax along the last dim over the real class columns only."""
    col = jax.lax.broadcasted_iota(jnp.int32, z.shape, 1)
    zm = jnp.where(col < num_classes, z, -1e30)
    m = jnp.max(zm, axis=-1, keepdims=True)
    s = zm - m
    lse = jnp.log(jnp.sum(jnp.exp(s), axis=-1, keepdims=True))
    return s - lse


# ----------------------------------------------------------------------------
# Fused kernel (small-N path): MLP on step k==0, then K propagation steps
#   H <- (1-alpha) * A_hat @ H + alpha * Z,  fused masked LogSoftmax at k==K-1.
# All matmul inputs are bf16; accumulation and elementwise math are f32.
# ----------------------------------------------------------------------------
def appnp_fused_kernel(x_ref, w1_ref, b1_ref, w2_ref, b2_ref, a_ref, o_ref,
                       z_ref, h_ref, *, alpha, num_classes):
    k = pl.program_id(0)

    @pl.when(k == 0)
    def _():
        # MLP (dropout = identity in eval): Z = relu(X @ W1 + b1) @ W2 + b2
        h1 = jnp.dot(x_ref[...], w1_ref[...],
                     preferred_element_type=jnp.float32) + b1_ref[...]
        h1 = jnp.maximum(h1, 0.0)  # ReLU (f32)
        z = jnp.dot(h1.astype(jnp.bfloat16), w2_ref[...],
                    preferred_element_type=jnp.float32) + b2_ref[...]
        z_ref[...] = z
        h_ref[...] = z  # H^(0) = Z

    h_new = (1.0 - alpha) * jnp.dot(
        a_ref[...], h_ref[...].astype(jnp.bfloat16),
        preferred_element_type=jnp.float32) + alpha * z_ref[...]
    h_ref[...] = h_new

    @pl.when(k == pl.num_programs(0) - 1)
    def _():
        o_ref[...] = _masked_log_softmax(h_new, num_classes).astype(o_ref.dtype)


# ----------------------------------------------------------------------------
# Split path, stage 1: row-tiled MLP (Linear -> ReLU -> Linear)
# ----------------------------------------------------------------------------
def mlp_kernel(x_ref, w1_ref, b1_ref, w2_ref, b2_ref, z_ref):
    h = jnp.dot(x_ref[...], w1_ref[...],
                preferred_element_type=jnp.float32) + b1_ref[...]
    h = jnp.maximum(h, 0.0)
    z = jnp.dot(h.astype(jnp.bfloat16), w2_ref[...],
                preferred_element_type=jnp.float32) + b2_ref[...]
    z_ref[...] = z.astype(z_ref.dtype)


# ----------------------------------------------------------------------------
# Split path, stage 2: K-step APPNP propagation with VMEM-carried H
# ----------------------------------------------------------------------------
def appnp_prop_kernel(a_ref, z_ref, o_ref, h_ref, *, alpha, num_classes):
    k = pl.program_id(0)

    @pl.when(k == 0)
    def _():
        h_ref[...] = z_ref[...]  # H^(0) = Z

    h_new = (1.0 - alpha) * jnp.dot(
        a_ref[...], h_ref[...].astype(jnp.bfloat16),
        preferred_element_type=jnp.float32) + alpha * z_ref[...]
    h_ref[...] = h_new

    @pl.when(k == pl.num_programs(0) - 1)
    def _():
        o_ref[...] = _masked_log_softmax(h_new, num_classes).astype(o_ref.dtype)


# ----------------------------------------------------------------------------
# Wrapper
# ----------------------------------------------------------------------------
def appnp_forward(x, w1, b1, w2, b2, a_hat, *, K=10, alpha=0.1,
                  row_tile=256, fuse=None):
    """x:[N,F], w1:[F,H], b1:[H], w2:[H,C], b2:[C], a_hat:[N,N] gcn-normalized."""
    assert K >= 1
    N, F = x.shape
    Hd = w1.shape[1]
    C = w2.shape[1]

    F_pad = _round_up(F, 128)
    H_pad = _round_up(Hd, 128)
    C_pad = _round_up(C, 128)

    def fused_bytes(n_pad):
        return (n_pad * n_pad * 2                       # A_hat bf16 (1 buffer)
                + n_pad * F_pad * 2                     # x bf16 (1 buffer)
                + F_pad * H_pad * 2 + H_pad * C_pad * 2  # weights bf16
                + (H_pad + C_pad) * 4                   # biases f32
                + 2 * n_pad * C_pad * 4                 # out f32 (2 buffers)
                + 2 * n_pad * C_pad * 4)                # Z + H scratch f32

    if fuse is None:
        # Fuse whenever the whole problem comfortably fits in VMEM
        # (conservative vs. v7x's 64 MiB/TC).
        fuse = fused_bytes(_round_up(N, 128)) <= (40 << 20)

    N_pad = _round_up(N, 128 if fuse else row_tile)

    f32, bf16 = jnp.float32, jnp.bfloat16
    x_p = jnp.zeros((N_pad, F_pad), bf16).at[:N, :F].set(x.astype(bf16))
    w1_p = jnp.zeros((F_pad, H_pad), bf16).at[:F, :Hd].set(w1.astype(bf16))
    b1_p = jnp.zeros((1, H_pad), f32).at[0, :Hd].set(b1)
    w2_p = jnp.zeros((H_pad, C_pad), bf16).at[:Hd, :C].set(w2.astype(bf16))
    b2_p = jnp.zeros((1, C_pad), f32).at[0, :C].set(b2)
    a_p = jnp.zeros((N_pad, N_pad), bf16).at[:N, :N].set(a_hat.astype(bf16))

    if fuse:
        # ---- Single fused call: MLP (k==0) + K propagation steps ------------
        kern = functools.partial(appnp_fused_kernel, alpha=float(alpha),
                                 num_classes=C)
        out = pl.pallas_call(
            kern,
            out_shape=jax.ShapeDtypeStruct((N_pad, C_pad), f32),
            grid=(K,),
            in_specs=[
                _resident_spec((N_pad, F_pad)),   # x
                _resident_spec((F_pad, H_pad)),   # W1
                _resident_spec((1, H_pad)),       # b1
                _resident_spec((H_pad, C_pad)),   # W2
                _resident_spec((1, C_pad)),       # b2
                _resident_spec((N_pad, N_pad)),   # A_hat
            ],
            out_specs=pl.BlockSpec((N_pad, C_pad), lambda k: (0, 0)),
            scratch_shapes=[pltpu.VMEM((N_pad, C_pad), f32),   # Z (resident)
                            pltpu.VMEM((N_pad, C_pad), f32)],  # H (carried)
            compiler_params=pltpu.CompilerParams(
                dimension_semantics=("arbitrary",),
                vmem_limit_bytes=_vmem_limit(fused_bytes(N_pad)),
            ),
        )(x_p, w1_p, b1_p, w2_p, b2_p, a_p)
        return out[:N, :C]

    # ---- Stage 1: MLP, row-tiled, "parallel" grid ----------------------------
    stage1_bytes = (2 * row_tile * F_pad * 2                     # x tiles (2 buf)
                    + F_pad * H_pad * 2 + H_pad * C_pad * 2      # weights (1 buf)
                    + (H_pad + C_pad) * 4
                    + 2 * row_tile * C_pad * 4)                  # out tiles
    z = pl.pallas_call(
        mlp_kernel,
        out_shape=jax.ShapeDtypeStruct((N_pad, C_pad), f32),
        grid=(N_pad // row_tile,),
        in_specs=[
            pl.BlockSpec((row_tile, F_pad), lambda i: (i, 0)),   # x tile, streamed
            _resident_spec((F_pad, H_pad)),                      # W1 (resident)
            _resident_spec((1, H_pad)),                          # b1
            _resident_spec((H_pad, C_pad)),                      # W2
            _resident_spec((1, C_pad)),                          # b2
        ],
        out_specs=pl.BlockSpec((row_tile, C_pad), lambda i: (i, 0)),
        compiler_params=pltpu.CompilerParams(
            dimension_semantics=("parallel",),
            vmem_limit_bytes=_vmem_limit(stage1_bytes),
        ),
    )(x_p, w1_p, b1_p, w2_p, b2_p)

    # ---- Stage 2: K-step propagation + LogSoftmax ----------------------------
    stage2_bytes = (N_pad * N_pad * 2            # A_hat bf16 (1 buffer)
                    + N_pad * C_pad * 4          # Z f32 (1 buffer)
                    + 2 * N_pad * C_pad * 4      # out f32 (2 buffers)
                    + N_pad * C_pad * 4)         # H scratch
    prop = functools.partial(appnp_prop_kernel, alpha=float(alpha), num_classes=C)
    out = pl.pallas_call(
        prop,
        out_shape=jax.ShapeDtypeStruct((N_pad, C_pad), f32),
        grid=(K,),
        in_specs=[
            _resident_spec((N_pad, N_pad)),   # A_hat (resident, single buffer)
            _resident_spec((N_pad, C_pad)),   # Z     (resident, single buffer)
        ],
        out_specs=pl.BlockSpec((N_pad, C_pad), lambda k: (0, 0)),
        scratch_shapes=[pltpu.VMEM((N_pad, C_pad), f32)],        # H, carried over K
        compiler_params=pltpu.CompilerParams(
            dimension_semantics=("arbitrary",),
            vmem_limit_bytes=_vmem_limit(stage2_bytes),
        ),
    )(a_p, z)
    return out[:N, :C]


# ----------------------------------------------------------------------------
# Demo / correctness check
# ----------------------------------------------------------------------------
if __name__ == "__main__":
    # Small shapes implied by the module: nodes=200, num_features=16,
    # hidden=32, num_classes=4, APPNP K=10, alpha=0.1.
    N, F, Hd, C = 200, 16, 32, 4
    K, alpha = 10, 0.1

    key = jax.random.PRNGKey(0)
    ke1, ke2, kx, k1, k2, k3, k4 = jax.random.split(key, 7)

    x = jax.random.normal(kx, (N, F), dtype=jnp.float32)

    # Random undirected graph -> dense gcn-normalized adjacency with self loops.
    E = 800
    src = jax.random.randint(ke1, (E,), 0, N)
    dst = jax.random.randint(ke2, (E,), 0, N)
    A = jnp.zeros((N, N), jnp.float32).at[src, dst].set(1.0)
    A = jnp.minimum(A + A.T, 1.0)                            # symmetrize
    A = A.at[jnp.arange(N), jnp.arange(N)].set(1.0)          # self loops (A + I)
    deg = jnp.sum(A, axis=1)
    d_inv_sqrt = 1.0 / jnp.sqrt(jnp.maximum(deg, 1e-12))
    A_hat = d_inv_sqrt[:, None] * A * d_inv_sqrt[None, :]    # D^-1/2 (A+I) D^-1/2

    # PyTorch-Linear-style init; weights stored (in_dim, out_dim): y = x @ W + b.
    lim1 = 1.0 / jnp.sqrt(F)
    lim2 = 1.0 / jnp.sqrt(Hd)
    w1 = jax.random.uniform(k1, (F, Hd), minval=-lim1, maxval=lim1, dtype=jnp.float32)
    b1 = jax.random.uniform(k2, (Hd,), minval=-lim1, maxval=lim1, dtype=jnp.float32)
    w2 = jax.random.uniform(k3, (Hd, C), minval=-lim2, maxval=lim2, dtype=jnp.float32)
    b2 = jax.random.uniform(k4, (C,), minval=-lim2, maxval=lim2, dtype=jnp.float32)

    # Fused single-call path (chosen automatically at this scale).
    out = appnp_forward(x, w1, b1, w2, b2, A_hat, K=K, alpha=alpha)
    out = jax.block_until_ready(out)
    # Also exercise the split two-kernel path (used for large N).
    out_split = appnp_forward(x, w1, b1, w2, b2, A_hat, K=K, alpha=alpha, fuse=False)
    out_split = jax.block_until_ready(out_split)

    # Reference matching the kernel's numerics (bf16 dot inputs, f32 accumulate).
    def bdot(a, b):
        return jnp.dot(a.astype(jnp.bfloat16), b.astype(jnp.bfloat16),
                       preferred_element_type=jnp.float32)

    h_m = jnp.maximum(bdot(x, w1) + b1, 0.0)
    z_m = bdot(h_m, w2) + b2
    hp_m = z_m
    for _ in range(K):
        hp_m = (1.0 - alpha) * bdot(A_hat, hp_m) + alpha * z_m
    ref = jax.nn.log_softmax(hp_m, axis=1)

    # Pure-f32 reference (semantic sanity check; loose tolerance for bf16 MXU).
    hi = jax.lax.Precision.HIGHEST
    h32 = jnp.maximum(jnp.dot(x, w1, precision=hi) + b1, 0.0)
    z32 = jnp.dot(h32, w2, precision=hi) + b2
    hp32 = z32
    for _ in range(K):
        hp32 = (1.0 - alpha) * jnp.dot(A_hat, hp32, precision=hi) + alpha * z32
    ref32 = jax.nn.log_softmax(hp32, axis=1)

    assert out.shape == (N, C)
    assert jnp.allclose(out, ref, atol=5e-3, rtol=5e-3), (
        float(jnp.max(jnp.abs(out - ref))))
    assert jnp.allclose(out_split, ref, atol=5e-3, rtol=5e-3), (
        float(jnp.max(jnp.abs(out_split - ref))))
    assert jnp.allclose(out, ref32, atol=1.5e-1, rtol=1.5e-1), (
        float(jnp.max(jnp.abs(out - ref32))))

    print("KERNEL_OK")
</pallas_src>

<mosaic_0001>
module attributes {stable_mosaic.version = 11 : i64} {
  func.func @appnp_fused_kernel(%arg0: i32, %arg1: memref<256x128xbf16, #tpu.memory_space<vmem>>, %arg2: memref<128x128xbf16, #tpu.memory_space<vmem>>, %arg3: memref<1x128xf32, #tpu.memory_space<vmem>>, %arg4: memref<128x128xbf16, #tpu.memory_space<vmem>>, %arg5: memref<1x128xf32, #tpu.memory_space<vmem>>, %arg6: memref<256x256xbf16, #tpu.memory_space<vmem>>, %arg7: memref<256x128xf32, #tpu.memory_space<vmem>>, %arg8: memref<256x128xf32, #tpu.memory_space<vmem>>, %arg9: memref<256x128xf32, #tpu.memory_space<vmem>>) attributes {dimension_semantics = [#tpu.dimension_semantics<arbitrary>], iteration_bounds = array<i64: 10>, scalar_prefetch = 0 : i64, scratch_operands = 2 : i64, tpu.core_type = #tpu.core_type<tc>, window_params = [{pipeline_mode = #tpu.pipeline_mode<synchronous>, transform_indices = @transform_0, window_bounds = array<i64: 256, 128>}, {pipeline_mode = #tpu.pipeline_mode<synchronous>, transform_indices = @transform_1, window_bounds = array<i64: 128, 128>}, {pipeline_mode = #tpu.pipeline_mode<synchronous>, transform_indices = @transform_2, window_bounds = array<i64: 1, 128>}, {pipeline_mode = #tpu.pipeline_mode<synchronous>, transform_indices = @transform_3, window_bounds = array<i64: 128, 128>}, {pipeline_mode = #tpu.pipeline_mode<synchronous>, transform_indices = @transform_4, window_bounds = array<i64: 1, 128>}, {pipeline_mode = #tpu.pipeline_mode<synchronous>, transform_indices = @transform_5, window_bounds = array<i64: 256, 256>}, {pipeline_mode = #tpu.pipeline_mode<synchronous>, transform_indices = @transform_6, window_bounds = array<i64: 256, 128>}]} {
    %c0_i32 = arith.constant 0 : i32
    %0 = arith.cmpi eq, %arg0, %c0_i32 : i32
    %1 = arith.extui %0 : i1 to i32
    %c0_i32_0 = arith.constant 0 : i32
    %2 = arith.cmpi ne, %1, %c0_i32_0 : i32
    scf.if %2 {
      %c0_11 = arith.constant 0 : index
      %c0_12 = arith.constant 0 : index
      %17 = vector.load %arg1[%c0_11, %c0_12] : memref<256x128xbf16, #tpu.memory_space<vmem>>, vector<256x128xbf16>
      %c0_13 = arith.constant 0 : index
      %c0_14 = arith.constant 0 : index
      %18 = vector.load %arg2[%c0_13, %c0_14] : memref<128x128xbf16, #tpu.memory_space<vmem>>, vector<128x128xbf16>
      %cst_15 = arith.constant dense<0.000000e+00> : vector<256x128xf32>
      %19 = tpu.matmul %17, %18, %cst_15 {dimension_numbers = #tpu.dot_dimension_numbers<[1], [0], [0], [1], [0, 0, 1, 1], [], []>} : vector<256x128xbf16>, vector<128x128xbf16>, vector<256x128xf32> -> vector<256x128xf32>
      %c0_16 = arith.constant 0 : index
      %c0_17 = arith.constant 0 : index
      %20 = vector.load %arg3[%c0_16, %c0_17] : memref<1x128xf32, #tpu.memory_space<vmem>>, vector<1x128xf32>
      %21 = vector.broadcast %20 : vector<1x128xf32> to vector<256x128xf32>
      %22 = arith.addf %19, %21 : vector<256x128xf32>
      %cst_18 = arith.constant 0.000000e+00 : f32
      %23 = vector.broadcast %cst_18 : f32 to vector<256x128xf32>
      %24 = arith.maximumf %22, %23 : vector<256x128xf32>
      %25 = arith.truncf %24 : vector<256x128xf32> to vector<256x128xbf16>
      %c0_19 = arith.constant 0 : index
      %c0_20 = arith.constant 0 : index
      %26 = vector.load %arg4[%c0_19, %c0_20] : memref<128x128xbf16, #tpu.memory_space<vmem>>, vector<128x128xbf16>
      %cst_21 = arith.constant dense<0.000000e+00> : vector<256x128xf32>
      %27 = tpu.matmul %25, %26, %cst_21 {dimension_numbers = #tpu.dot_dimension_numbers<[1], [0], [0], [1], [0, 0, 1, 1], [], []>} : vector<256x128xbf16>, vector<128x128xbf16>, vector<256x128xf32> -> vector<256x128xf32>
      %c0_22 = arith.constant 0 : index
      %c0_23 = arith.constant 0 : index
      %28 = vector.load %arg5[%c0_22, %c0_23] : memref<1x128xf32, #tpu.memory_space<vmem>>, vector<1x128xf32>
      %29 = vector.broadcast %28 : vector<1x128xf32> to vector<256x128xf32>
      %30 = arith.addf %27, %29 : vector<256x128xf32>
      %c0_24 = arith.constant 0 : index
      %c0_25 = arith.constant 0 : index
      %31 = vector.load %arg8[%c0_24, %c0_25] : memref<256x128xf32, #tpu.memory_space<vmem>>, vector<256x128xf32>
      tpu.vector_store %arg8[%c0_24, %c0_25], %30 {strides = array<i32>} : memref<256x128xf32, #tpu.memory_space<vmem>>, vector<256x128xf32>,
      %c0_26 = arith.constant 0 : index
      %c0_27 = arith.constant 0 : index
      %32 = vector.load %arg9[%c0_26, %c0_27] : memref<256x128xf32, #tpu.memory_space<vmem>>, vector<256x128xf32>
      tpu.vector_store %arg9[%c0_26, %c0_27], %30 {strides = array<i32>} : memref<256x128xf32, #tpu.memory_space<vmem>>, vector<256x128xf32>,
    } else {
    }
    %c0 = arith.constant 0 : index
    %c0_1 = arith.constant 0 : index
    %3 = vector.load %arg6[%c0, %c0_1] : memref<256x256xbf16, #tpu.memory_space<vmem>>, vector<256x256xbf16>
    %c0_2 = arith.constant 0 : index
    %c0_3 = arith.constant 0 : index
    %4 = vector.load %arg9[%c0_2, %c0_3] : memref<256x128xf32, #tpu.memory_space<vmem>>, vector<256x128xf32>
    %5 = arith.truncf %4 : vector<256x128xf32> to vector<256x128xbf16>
    %cst = arith.constant dense<0.000000e+00> : vector<256x128xf32>
    %6 = tpu.matmul %3, %5, %cst {dimension_numbers = #tpu.dot_dimension_numbers<[1], [0], [0], [1], [0, 0, 1, 1], [], []>} : vector<256x256xbf16>, vector<256x128xbf16>, vector<256x128xf32> -> vector<256x128xf32>
    %cst_4 = arith.constant 0.899999976 : f32
    %7 = vector.broadcast %cst_4 : f32 to vector<256x128xf32>
    %8 = arith.mulf %7, %6 : vector<256x128xf32>
    %c0_5 = arith.constant 0 : index
    %c0_6 = arith.constant 0 : index
    %9 = vector.load %arg8[%c0_5, %c0_6] : memref<256x128xf32, #tpu.memory_space<vmem>>, vector<256x128xf32>
    %cst_7 = arith.constant 1.000000e-01 : f32
    %10 = vector.broadcast %cst_7 : f32 to vector<256x128xf32>
    %11 = arith.mulf %10, %9 : vector<256x128xf32>
    %12 = arith.addf %8, %11 : vector<256x128xf32>
    %c0_8 = arith.constant 0 : index
    %c0_9 = arith.constant 0 : index
    %13 = vector.load %arg9[%c0_8, %c0_9] : memref<256x128xf32, #tpu.memory_space<vmem>>, vector<256x128xf32>
    tpu.vector_store %arg9[%c0_8, %c0_9], %12 {strides = array<i32>} : memref<256x128xf32, #tpu.memory_space<vmem>>, vector<256x128xf32>,
    %c9_i32 = arith.constant 9 : i32
    %14 = arith.cmpi eq, %arg0, %c9_i32 : i32
    %15 = arith.extui %14 : i1 to i32
    %c0_i32_10 = arith.constant 0 : i32
    %16 = arith.cmpi ne, %15, %c0_i32_10 : i32
    scf.if %16 {
      %17 = tpu.iota {dimensions = array<i32: 1>} : vector<256x128xi32>
      %c4_i32 = arith.constant 4 : i32
      %18 = vector.broadcast %c4_i32 : i32 to vector<256x128xi32>
      %19 = arith.cmpi slt, %17, %18 : vector<256x128xi32>
      %cst_11 = arith.constant -1.000000e+30 : f32
      %20 = vector.broadcast %cst_11 : f32 to vector<256x128xf32>
      %21 = arith.select %19, %12, %20 : vector<256x128xi1>, vector<256x128xf32>
      %cst_12 = arith.constant dense<0xFF800000> : vector<256xf32>
      %22 = vector.multi_reduction <maximumf>, %21, %cst_12 [1] : vector<256x128xf32> to vector<256xf32>
      %23 = vector.shape_cast %22 : vector<256xf32> to vector<256x1xf32>
      %24 = vector.broadcast %23 : vector<256x1xf32> to vector<256x128xf32>
      %25 = arith.subf %21, %24 : vector<256x128xf32>
      %26 = math.exp %25 : vector<256x128xf32>
      %cst_13 = arith.constant dense<0.000000e+00> : vector<256xf32>
      %27 = vector.multi_reduction <add>, %26, %cst_13 [1] : vector<256x128xf32> to vector<256xf32>
      %28 = vector.shape_cast %27 : vector<256xf32> to vector<256x1xf32>
      %29 = math.log %28 : vector<256x1xf32>
      %30 = vector.broadcast %29 : vector<256x1xf32> to vector<256x128xf32>
      %31 = arith.subf %25, %30 : vector<256x128xf32>
      %c0_14 = arith.constant 0 : index
      %c0_15 = arith.constant 0 : index
      %32 = vector.load %arg7[%c0_14, %c0_15] : memref<256x128xf32, #tpu.memory_space<vmem>>, vector<256x128xf32>
      tpu.vector_store %arg7[%c0_14, %c0_15], %31 {strides = array<i32>} : memref<256x128xf32, #tpu.memory_space<vmem>>, vector<256x128xf32>,
    } else {
    }
    return
  }
  func.func @transform_0(%arg0: i32) -> (i32, i32) {
    %c0_i32 = arith.constant 0 : i32
    %c0_i32_0 = arith.constant 0 : i32
    %c0_i32_1 = arith.constant 0 : i32
    return %c0_i32, %c0_i32_0 : i32, i32
  }
  func.func @transform_1(%arg0: i32) -> (i32, i32) {
    %c0_i32 = arith.constant 0 : i32
    %c0_i32_0 = arith.constant 0 : i32
    %c0_i32_1 = arith.constant 0 : i32
    return %c0_i32, %c0_i32_0 : i32, i32
  }
  func.func @transform_2(%arg0: i32) -> (i32, i32) {
    %c0_i32 = arith.constant 0 : i32
    %c0_i32_0 = arith.constant 0 : i32
    %c0_i32_1 = arith.constant 0 : i32
    return %c0_i32, %c0_i32_0 : i32, i32
  }
  func.func @transform_3(%arg0: i32) -> (i32, i32) {
    %c0_i32 = arith.constant 0 : i32
    %c0_i32_0 = arith.constant 0 : i32
    %c0_i32_1 = arith.constant 0 : i32
    return %c0_i32, %c0_i32_0 : i32, i32
  }
  func.func @transform_4(%arg0: i32) -> (i32, i32) {
    %c0_i32 = arith.constant 0 : i32
    %c0_i32_0 = arith.constant 0 : i32
    %c0_i32_1 = arith.constant 0 : i32
    return %c0_i32, %c0_i32_0 : i32, i32
  }
  func.func @transform_5(%arg0: i32) -> (i32, i32) {
    %c0_i32 = arith.constant 0 : i32
    %c0_i32_0 = arith.constant 0 : i32
    %c0_i32_1 = arith.constant 0 : i32
    return %c0_i32, %c0_i32_0 : i32, i32
  }
  func.func @transform_6(%arg0: i32) -> (i32, i32) {
    %c0_i32 = arith.constant 0 : i32
    %c0_i32_0 = arith.constant 0 : i32
    %c0_i32_1 = arith.constant 0 : i32
    return %c0_i32, %c0_i32_0 : i32, i32
  }
}

</mosaic_0001>

<bundles_post_ra>
// kernel: tpu_custom_call.1
= control target key start
LH: loop header
LB: loop body
LE: loop exit
PB: predicated region body
PF: predicated region fallthrough
CT: control target
= control target key end

     0   :  { %11 = vsyncpa [#allocation5], 0  ;;  %s3543_s0 = inlined_call_operand.hbm [shape: bf16[256,128], index: 0, kind: input, shape index: {}]   ;;  %s3544_s1 = inlined_call_operand.hbm [shape: bf16[128,128], index: 1, kind: input, shape index: {}]   ;;  %s3545_s2 = inlined_call_operand.vmem [shape: f32[1,128], index: 2, kind: input, shape index: {}]   ;;  %s3546_s3 = inlined_call_operand.hbm [shape: bf16[128,128], index: 3, kind: input, shape index: {}]   ;;  %s3547_s4 = inlined_call_operand.vmem [shape: f32[1,128], index: 4, kind: input, shape index: {}]   ;;  %s3548_s5 = inlined_call_operand.hbm [shape: bf16[256,256], index: 5, kind: input, shape index: {}]   ;;  %s3549_s6 = inlined_call_operand.hbm [shape: f32[256,128], index: 6, kind: output, shape index: {}]  }
   0x1   :  { %12 = vsyncpa [#allocation8], 0 }
   0x2   :  { %13 = vsyncpa [#allocation11], 0 }
   0x3   :  { %14 = vsyncpa [#allocation6], 0  ;;  %s2848_s21 = smov 0  }
   0x4 LB: > { %s2854_s22 = sadd.s32 4294967295, %s2800_s21   ;;  %p2016_p0 = scmp.ge.s32.totalorder %s2800_s21, 1  ;;  %s2800_s21 = sphi %s2848_s21, %s20_s21  }
   0x5   : > { %p172_p1 = scmp.lt.s32.totalorder %s2800_s21, 11  ;;  %p3550_p3 = scmp.eq.s32.totalorder %s2854_s22, 0 }
   0x6   : > { %s2802_s24 = smov [#allocation7]   ;;  %s2803_s26 = smov [#allocation4]  }
   0x7   : > { %p2860_p4 = pnand %p2016_p0, %p172_p1  ;;  %s197_s25 = sshll.u32 %s2802_s24, 4  ;;  %s2864_s25 = int_to_ptr.vmem [resolvable:$true] %s197_s25 }
   0x8   : > { %s184_s27 = sshll.u32 %s2803_s26, 4  ;;  %s2804_s29 = smov [#allocation9]   ;;  %s2868_s27 = int_to_ptr.vmem [resolvable:$true] %s184_s27 }
   0x9   : > { %s3552_s23 = scalar_select %p2860_p4, 1, 0 }
   0xa   : > { %p2390_p5 = pneg %p2860_p4  ;;  %s213_s30 = sshll.u32 %s2804_s29, 4  ;;  %s2876_s30 = int_to_ptr.vmem [resolvable:$true] %s213_s30 }
   0xb   : > { %s2805_s7 = smov [#allocation10]   ;;  %s2640_s11 = scalar_lea.hbm %s3544_s1, 1024 }
   0xc   : > { %p2872_p6 = pnand %p3550_p3, %p2390_p5  ;;  %s2878_s8 = sshll.u32 %s2805_s7, 4  ;;  %s230_s8 = int_to_ptr.vmem [resolvable:$true] %s2878_s8 }
   0xd   : > { %p2641_p7 = scmp.ne.s32.totalorder %s3544_s1, %s2640_s11  ;;  %p2647_p11 = scmp.lt.u32.totalorder %s2640_s11, %s3544_s1 }
   0xe   : > { %p2888_p8 = pneg %p2872_p6 }
  0x10   : > { %p2643_p9 = pnand %p2888_p8, %p2641_p7 }
  0x12   : > { %p2644_p10 = pneg %p2643_p9 }
  0x14   : > { %p2649_p12 = pnand %p2647_p11, %p2644_p10 }
  0x16   : > { %2652 = shalt.err (!%p2649_p12)
}
  0x17   : > { %s2653_s17 = scalar_lea.vmem %s2864_s25, 1024  ;;  %p2661_p5 = scmp.lt.s32.totalorder %s2864_s25, %s2864_s25 }
  0x18   : > { %p2654_p13 = scmp.ne.s32.totalorder %s2864_s25, %s2653_s17  ;;  %p2662_p2 = scmp.lt.s32.totalorder %s2653_s17, %s2653_s17 }
  0x1a   : > { %p2656_p0 = pnand %p2654_p13, %p2888_p8  ;;  %p2663_p7 = por %p2662_p2, %p2661_p5 }
  0x1c   : > { %p2657_p1 = pneg %p2656_p0 }
  0x1e   : > { %p2664_p9 = pnand %p2663_p7, %p2657_p1 }
  0x20   : > { %2667 = shalt.err (!%p2664_p9)
}
  0x21   : > { %s2806_s18 = smov 64   ;;  %s2807_s19 = smov 4  }
  0x22   : > { %2396 = dma.hbm_to_vmem [thread:$0]  (!%p2872_p6), %s3544_s1, 1024, %s2864_s25, [#allocation8], %s2806_s18, %s2806_s18, %s2807_s19  }
  0x23   : > { %s2668_s7 = scalar_lea.hbm %s3543_s0, 2048 }
  0x24   : > { %p2669_p2 = scmp.ne.s32.totalorder %s3543_s0, %s2668_s7  ;;  %p2675_p12 = scmp.lt.u32.totalorder %s2668_s7, %s3543_s0 }
  0x26   : > { %p2671_p10 = pnand %p2669_p2, %p2888_p8 }
  0x28   : > { %p2672_p11 = pneg %p2671_p10 }
  0x2a   : > { %p2677_p13 = pnand %p2675_p12, %p2672_p11 }
  0x2c   : > { %2680 = shalt.err (!%p2677_p13)
}
  0x2d   : > { %s2681_s25 = scalar_lea.vmem %s2868_s27, 2048  ;;  %p2689_p7 = scmp.lt.s32.totalorder %s2868_s27, %s2868_s27 }
  0x2e   : > { %p2682_p0 = scmp.ne.s32.totalorder %s2868_s27, %s2681_s25  ;;  %p2690_p9 = scmp.lt.s32.totalorder %s2681_s25, %s2681_s25 }
  0x30   : > { %p2684_p1 = pnand %p2682_p0, %p2888_p8  ;;  %p2691_p2 = por %p2690_p9, %p2689_p7 }
  0x32   : > { %p2685_p5 = pneg %p2684_p1 }
  0x34   : > { %p2692_p10 = pnand %p2691_p2, %p2685_p5 }
  0x36   : > { %2695 = shalt.err (!%p2692_p10)
}
  0x37   : > { %2393 = dma.hbm_to_vmem [thread:$0]  (!%p2872_p6), %s3543_s0, 2048, %s2868_s27, [#allocation5], %s2806_s18, %s2806_s18, %s2807_s19  }
  0x38   : > { %s2696_s20 = scalar_lea.hbm %s3546_s3, 1024 }
  0x39   : > { %p2697_p11 = scmp.ne.s32.totalorder %s3546_s3, %s2696_s20  ;;  %p2703_p0 = scmp.lt.u32.totalorder %s2696_s20, %s3546_s3 }
  0x3b   : > { %p2699_p12 = pnand %p2697_p11, %p2888_p8 }
  0x3d   : > { %p2700_p13 = pneg %p2699_p12 }
  0x3f   : > { %p2705_p1 = pnand %p2703_p0, %p2700_p13 }
  0x41   : > { %2708 = shalt.err (!%p2705_p1)
}
  0x42   : > { %s2709_s27 = scalar_lea.vmem %s2876_s30, 1024  ;;  %p2717_p2 = scmp.lt.s32.totalorder %s2876_s30, %s2876_s30 }
  0x43   : > { %p2710_p5 = scmp.ne.s32.totalorder %s2876_s30, %s2709_s27  ;;  %p2718_p10 = scmp.lt.s32.totalorder %s2709_s27, %s2709_s27 }
  0x45   : > { %p2712_p7 = pnand %p2710_p5, %p2888_p8  ;;  %p2719_p11 = por %p2718_p10, %p2717_p2 }
  0x47   : > { %p2713_p9 = pneg %p2712_p7 }
  0x49   : > { %p2720_p12 = pnand %p2719_p11, %p2713_p9 }
  0x4b   : > { %2723 = shalt.err (!%p2720_p12)
}
  0x4c   : > { %2399 = dma.hbm_to_vmem [thread:$0]  (!%p2872_p6), %s3546_s3, 1024, %s2876_s30, [#allocation8], %s2806_s18, %s2806_s18, %s2807_s19  }
  0x4d   : > { %s2724_s25 = scalar_lea.hbm %s3548_s5, 4096 }
  0x4e   : > { %p2725_p13 = scmp.ne.s32.totalorder %s3548_s5, %s2724_s25  ;;  %p2731_p5 = scmp.lt.u32.totalorder %s2724_s25, %s3548_s5 }
  0x50   : > { %p2727_p0 = pnand %p2725_p13, %p2888_p8 }
  0x52   : > { %p2728_p1 = pneg %p2727_p0 }
  0x54   : > { %p2733_p7 = pnand %p2731_p5, %p2728_p1 }
  0x56   : > { %2736 = shalt.err (!%p2733_p7)
}
  0x57   : > { %s2737_s20 = scalar_lea.vmem %s230_s8, 4096  ;;  %p2745_p11 = scmp.lt.s32.totalorder %s230_s8, %s230_s8 }
  0x58   : > { %p2738_p9 = scmp.ne.s32.totalorder %s230_s8, %s2737_s20  ;;  %p2746_p12 = scmp.lt.s32.totalorder %s2737_s20, %s2737_s20 }
  0x5a   : > { %p2740_p2 = pnand %p2738_p9, %p2888_p8  ;;  %p2747_p3 = por %p2746_p12, %p2745_p11 }
  0x5c   : > { %p2741_p10 = pneg %p2740_p2 }
  0x5e   : > { %p2748_p4 = pnand %p2747_p3, %p2741_p10 }
  0x60   : > { %2751 = shalt.err (!%p2748_p4)
}
  0x61   : > { %s2808_s30 = smov 128   ;;  %s2809_s18 = smov 8  }
  0x62   : > { %2402 = dma.hbm_to_vmem [thread:$0]  (!%p2872_p6), %s3548_s5, 4096, %s230_s8, [#allocation11], %s2808_s30, %s2808_s30, %s2809_s18  }
  0x63   : > { %p3555_p13 = scmp.ne.s32.totalorder %s3552_s23, 0 }
  0x64   : > { %p3556_p0 = scmp.eq.s32.totalorder (!%p3555_p13), %s2854_s22, 0 }
  0x65   : > { %245 = sbr.rel (%p3555_p13) target bundleno = 1356 (0x54c), region = 44 }
  0x6c   : > { %2783 = dma.done.wait (%p3556_p0), [#allocation5], 2048   ;;  %p3557_p8 = pmov %p3556_p0 }
  0x6d   : > { %p3558_p3 = pmov %p3556_p0 }
  0x6e   : > { %2785 = vsyncadd (%p3557_p8), [#allocation5], 4294965248 }
  0x6f   : > { %2787 = dma.done.wait (%p3558_p3), [#allocation8], 2048   ;;  %p3559_p4 = pmov %p3556_p0 }
  0x70   : > { %p3560_p1 = pmov %p3556_p0 }
  0x71   : > { %2789 = vsyncadd (%p3559_p4), [#allocation8], 4294965248 }
  0x72   : > { %2791 = dma.done.wait (%p3560_p1), [#allocation11], 4096   ;;  %p3561_p6 = pmov %p3556_p0 }
  0x73   : > { %p3562_p5 = scmp.ne.s32.totalorder %s2854_s22, 0 }
  0x74   : > { %2793 = vsyncadd (%p3561_p6), [#allocation11], 4294963200  ;;  %v2432_v0 = vld [vmem:[#allocation7] sm:$0xff] (!%p3562_p5)   ;;  %v2433_v1 = vld [vmem:[#allocation7 + $0x8] sm:$0xff] (!%p3562_p5)  }
  0x75   : > { %281 = sbr.rel (%p3562_p5) target bundleno = 645 (0x285), region = 64  ;;  %2258 = vmatprep.subr.bf16.mxu0 (!%p3562_p5), %v2432_v0  ;;  %v2434_v2 = vld [vmem:[#allocation7 + $0x10] sm:$0xff] (!%p3562_p5)   ;;  %v2435_v3 = vld [vmem:[#allocation7 + $0x18] sm:$0xff] (!%p3562_p5)   ;;  %v2440_v4 = vld [vmem:[#allocation4] sm:$0xff] (!%p3562_p5)  }
  0x76   : > { %2259 = vmatpush3.bf16.msra.mxu0 (!%p3562_p5), %v2432_v0  ;;  %2274 = vmatprep.mubr.bf16.mxu0 (!%p3562_p5), %v2440_v4  ;;  %v2436_v5 = vld [vmem:[#allocation7 + $0x20] sm:$0xff] (!%p3562_p5)   ;;  %v2437_v6 = vld [vmem:[#allocation7 + $0x28] sm:$0xff] (!%p3562_p5)   ;;  %v2438_v7 = vld [vmem:[#allocation7 + $0x30] sm:$0xff] (!%p3562_p5)  }
  0x77   : > { %2260 = vmatprep.subr.bf16.mxu0 (!%p3562_p5), %v2433_v1  ;;  %v2439_v8 = vld [vmem:[#allocation7 + $0x38] sm:$0xff] (!%p3562_p5)   ;;  %v2456_v9 = vld [vmem:[#allocation9] sm:$0xff] (!%p3562_p5)   ;;  %v2457_v10 = vld [vmem:[#allocation9 + $0x8] sm:$0xff] (!%p3562_p5)  }
  0x78   : > { %2306 = vmatprep.subr.bf16.mxu1 (!%p3562_p5), %v2456_v9  ;;  %v2458_v11 = vld [vmem:[#allocation9 + $0x10] sm:$0xff] (!%p3562_p5)   ;;  %v2441_v12 = vld [vmem:[#allocation4 + $0x8] sm:$0xff] (!%p3562_p5)   ;;  %v2459_v14 = vld [vmem:[#allocation9 + $0x18] sm:$0xff] (!%p3562_p5)  }
  0x79   : > { %2307 = vmatpush3.bf16.msra.mxu1 (!%p3562_p5), %v2456_v9  ;;  %v2442_v13 = vld [vmem:[#allocation4 + $0x10] sm:$0xff] (!%p3562_p5)   ;;  %v2460_v15 = vld [vmem:[#allocation9 + $0x20] sm:$0xff] (!%p3562_p5)   ;;  %v2443_v16 = vld [vmem:[#allocation4 + $0x18] sm:$0xff] (!%p3562_p5)  }
  0x7a   : > { %2261 = vmatpush3.bf16.msra.mxu0 (!%p3562_p5), %v2433_v1  ;;  %2308 = vmatprep.subr.bf16.mxu1 (!%p3562_p5), %v2457_v10  ;;  %v2444_v17 = vld [vmem:[#allocation4 + $0x20] sm:$0xff] (!%p3562_p5)   ;;  %v2461_v18 = vld [vmem:[#allocation9 + $0x28] sm:$0xff] (!%p3562_p5)   ;;  %v2446_v20 = vld [vmem:[#allocation4 + $0x30] sm:$0xff] (!%p3562_p5)  }
  0x7b   : > { %2262 = vmatprep.subr.bf16.mxu0 (!%p3562_p5), %v2434_v2  ;;  %v2445_v19 = vld [vmem:[#allocation4 + $0x28] sm:$0xff] (!%p3562_p5)   ;;  %v2447_v21 = vld [vmem:[#allocation4 + $0x38] sm:$0xff] (!%p3562_p5)   ;;  %v2448_v22 = vld [vmem:[#allocation4 + $0x40] sm:$0xff] (!%p3562_p5)  }
  0x7c   : > { %v2449_v23 = vld [vmem:[#allocation4 + $0x48] sm:$0xff]   ;;  %v2450_v24 = vld [vmem:[#allocation4 + $0x50] sm:$0xff]   ;;  %v2451_v25 = vld [vmem:[#allocation4 + $0x58] sm:$0xff]  }
  0x7d   : > { %2309 = vmatpush3.bf16.msra.mxu1 %v2457_v10  ;;  %v2452_v26 = vld [vmem:[#allocation4 + $0x60] sm:$0xff]   ;;  %v2453_v27 = vld [vmem:[#allocation4 + $0x68] sm:$0xff]   ;;  %v2454_v28 = vld [vmem:[#allocation4 + $0x70] sm:$0xff]  }
  0x7e   : > { %2263 = vmatpush3.bf16.msra.mxu0 %v2434_v2  ;;  %2310 = vmatprep.subr.bf16.mxu1 %v2458_v11  ;;  %v2455_v29 = vld [vmem:[#allocation4 + $0x78] sm:$0xff]   ;;  %v2462_v30 = vld [vmem:[#allocation9 + $0x30] sm:$0xff]   ;;  %v3002_v32 = vld [vmem:[%s3545_s2] ss:$0 sm:$0xff] }
  0x7f   : > { %2264 = vmatprep.subr.bf16.mxu0 %v2435_v3  ;;  %v2463_v31 = vld [vmem:[#allocation9 + $0x38] sm:$0xff]  }
  0x81   : > { %2311 = vmatpush3.bf16.msra.mxu1 %v2458_v11 }
  0x82   : > { %2265 = vmatpush3.bf16.msra.mxu0 %v2435_v3  ;;  %2312 = vmatprep.subr.bf16.mxu1 %v2459_v14 }
  0x83   : > { %2266 = vmatprep.subr.bf16.mxu0 %v2436_v5 }
  0x85   : > { %2313 = vmatpush3.bf16.msra.mxu1 %v2459_v14 }
  0x86   : > { %2267 = vmatpush3.bf16.msra.mxu0 %v2436_v5  ;;  %2314 = vmatprep.subr.bf16.mxu1 %v2460_v15 }
  0x87   : > { %2268 = vmatprep.subr.bf16.mxu0 %v2437_v6 }
  0x89   : > { %2315 = vmatpush3.bf16.msra.mxu1 %v2460_v15 }
  0x8a   : > { %2269 = vmatpush3.bf16.msra.mxu0 %v2437_v6  ;;  %2316 = vmatprep.subr.bf16.mxu1 %v2461_v18 }
  0x8b   : > { %2270 = vmatprep.subr.bf16.mxu0 %v2438_v7 }
  0x8d   : > { %2317 = vmatpush3.bf16.msra.mxu1 %v2461_v18 }
  0x8e   : > { %2271 = vmatpush3.bf16.msra.mxu0 %v2438_v7  ;;  %2318 = vmatprep.subr.bf16.mxu1 %v2462_v30 }
  0x8f   : > { %2272 = vmatprep.subr.bf16.mxu0 %v2439_v8 }
  0x91   : > { %2319 = vmatpush3.bf16.msra.mxu1 %v2462_v30 }
  0x92   : > { %2273 = vmatpush3.bf16.msra.mxu0 %v2439_v8  ;;  %2320 = vmatprep.subr.bf16.mxu1 %v2463_v31 }
  0x95   : > { %2275 = vmatmul.mubr.bf16.vlgmr.msra.gmra.mrb[0].mxu0 %v2441_v12  ;;  %2321 = vmatpush3.bf16.msra.mxu1 %v2463_v31 }
  0x96   : > { %2278 = vmatprep.mubr.bf16.mxu0 %v2442_v13 }
  0x9d   : > { %2279 = vmatmul.mubr.bf16.gmra.mrb[4].mxu0 %v2443_v16 }
  0x9e   : > { %2282 = vmatprep.mubr.bf16.mxu0 %v2444_v17 }
  0xa5   : > { %2283 = vmatmul.mubr.bf16.gmra.mrb[8].mxu0 %v2445_v19 }
  0xa6   : > { %2286 = vmatprep.mubr.bf16.mxu0 %v2446_v20 }
  0xad   : > { %2287 = vmatmul.mubr.bf16.gmra.mrb[12].mxu0 %v2447_v21 }
  0xae   : > { %2290 = vmatprep.mubr.bf16.mxu0 %v2448_v22 }
  0xb5   : > { %2291 = vmatmul.mubr.bf16.gmra.mrb[16].mxu0 %v2449_v23 }
  0xb6   : > { %2294 = vmatprep.mubr.bf16.mxu0 %v2450_v24 }
  0xbd   : > { %2295 = vmatmul.mubr.bf16.gmra.mrb[20].mxu0 %v2451_v25 }
  0xbe   : > { %2298 = vmatprep.mubr.bf16.mxu0 %v2452_v26 }
  0xc5   : > { %2299 = vmatmul.mubr.bf16.gmra.mrb[24].mxu0 %v2453_v27 }
  0xc6   : > { %2302 = vmatprep.mubr.bf16.mxu0 %v2454_v28 }
  0xcd   : > { %2303 = vmatmul.mubr.bf16.gmra.mrb[28].mxu0 %v2455_v29 }
 0x168   : > { %v2276_v33 = vpop.f32.mrb[0].mxu0 }
 0x169   : > { %v524_v34 = vadd.f32 %v2276_v33, %v3002_v32  ;;  %v515_v35 = vpop.f32.mrb[1].mxu0 }
 0x16a   : > { %v516_v36 = vadd.f32 %v3002_v32, %v515_v35  ;;  %v2277_v37 = vpop.f32.mrb[2].mxu0 }
 0x16b   : > { %v527_v38 = vadd.f32 %v2277_v37, %v3002_v32  ;;  %v518_v39 = vpop.f32.mrb[3].mxu0  ;;  %v644_v41 = vmax.f32 %v524_v34, 0.0 }
 0x16c   : > { %v519_v40 = vadd.f32 %v3002_v32, %v518_v39  ;;  %v642_v43 = vmax.f32 %v516_v36, 0.0 }
 0x16d   : > { %v645_v42 = vmax.f32 %v527_v38, 0.0 }
 0x16e   : > { %v643_v44 = vmax.f32 %v519_v40, 0.0 }
 0x16f   : > { %v675_v45 = vpack.c.bf16 %v645_v42, %v644_v41 }
 0x170   : > { %v2280_v46 = vpop.f32.mrb[4].mxu0  ;;  %v674_v47 = vpack.c.bf16 %v643_v44, %v642_v43 }
 0x171   : > { %v540_v48 = vadd.f32 %v2280_v46, %v3002_v32  ;;  %v531_v49 = vpop.f32.mrb[5].mxu0 }
 0x172   : > { %v532_v50 = vadd.f32 %v3002_v32, %v531_v49  ;;  %v2281_v51 = vpop.f32.mrb[6].mxu0  ;;  %2322 = vmatprep.mubr.bf16.mxu1 %v674_v47 }
 0x173   : > { %v543_v52 = vadd.f32 %v2281_v51, %v3002_v32  ;;  %v534_v53 = vpop.f32.mrb[7].mxu0  ;;  %2323 = vmatmul.mubr.bf16.vlgmr.msra.gmra.mrb[0].mxu1 %v675_v45  ;;  %v648_v55 = vmax.f32 %v540_v48, 0.0 }
 0x174   : > { %v535_v54 = vadd.f32 %v3002_v32, %v534_v53  ;;  %v646_v57 = vmax.f32 %v532_v50, 0.0 }
 0x175   : > { %v649_v56 = vmax.f32 %v543_v52, 0.0 }
 0x176   : > { %v647_v58 = vmax.f32 %v535_v54, 0.0 }
 0x177   : > { %v677_v59 = vpack.c.bf16 %v649_v56, %v648_v55 }
 0x178   : > { %v676_v60 = vpack.c.bf16 %v647_v58, %v646_v57  ;;  %v2284_v61 = vpop.f32.mrb[8].mxu0 }
 0x179   : > { %v556_v62 = vadd.f32 %v2284_v61, %v3002_v32  ;;  %v547_v63 = vpop.f32.mrb[9].mxu0 }
 0x17a   : > { %v548_v0 = vadd.f32 %v3002_v32, %v547_v63  ;;  %v2285_v1 = vpop.f32.mrb[10].mxu0  ;;  %2326 = vmatprep.mubr.bf16.mxu1 %v676_v60 }
 0x17b   : > { %v559_v2 = vadd.f32 %v2285_v1, %v3002_v32  ;;  %v550_v3 = vpop.f32.mrb[11].mxu0  ;;  %2327 = vmatmul.mubr.bf16.gmra.mrb[4].mxu1 %v677_v59  ;;  %v652_v5 = vmax.f32 %v556_v62, 0.0 }
 0x17c   : > { %v551_v4 = vadd.f32 %v3002_v32, %v550_v3  ;;  %v650_v7 = vmax.f32 %v548_v0, 0.0 }
 0x17d   : > { %v653_v6 = vmax.f32 %v559_v2, 0.0 }
 0x17e   : > { %v651_v8 = vmax.f32 %v551_v4, 0.0 }
 0x17f   : > { %v679_v9 = vpack.c.bf16 %v653_v6, %v652_v5 }
 0x180   : > { %v678_v10 = vpack.c.bf16 %v651_v8, %v650_v7  ;;  %v2288_v11 = vpop.f32.mrb[12].mxu0 }
 0x181   : > { %v572_v12 = vadd.f32 %v2288_v11, %v3002_v32  ;;  %v563_v13 = vpop.f32.mrb[13].mxu0 }
 0x182   : > { %v564_v14 = vadd.f32 %v3002_v32, %v563_v13  ;;  %v2289_v15 = vpop.f32.mrb[14].mxu0  ;;  %2330 = vmatprep.mubr.bf16.mxu1 %v678_v10 }
 0x183   : > { %v575_v16 = vadd.f32 %v2289_v15, %v3002_v32  ;;  %v566_v17 = vpop.f32.mrb[15].mxu0  ;;  %2331 = vmatmul.mubr.bf16.gmra.mrb[8].mxu1 %v679_v9  ;;  %v656_v19 = vmax.f32 %v572_v12, 0.0 }
 0x184   : > { %v567_v18 = vadd.f32 %v3002_v32, %v566_v17  ;;  %v654_v21 = vmax.f32 %v564_v14, 0.0 }
 0x185   : > { %v657_v20 = vmax.f32 %v575_v16, 0.0 }
 0x186   : > { %v655_v22 = vmax.f32 %v567_v18, 0.0  ;;  %v3039_v18 = vld [vmem:[%s3547_s4] ss:$0 sm:$0xff] }
 0x187   : > { %v681_v23 = vpack.c.bf16 %v657_v20, %v656_v19 }
 0x188   : > { %v680_v24 = vpack.c.bf16 %v655_v22, %v654_v21  ;;  %v2292_v25 = vpop.f32.mrb[16].mxu0 }
 0x189   : > { %v588_v26 = vadd.f32 %v2292_v25, %v3002_v32  ;;  %v579_v27 = vpop.f32.mrb[17].mxu0 }
 0x18a   : > { %v580_v28 = vadd.f32 %v3002_v32, %v579_v27  ;;  %v2293_v29 = vpop.f32.mrb[18].mxu0  ;;  %2334 = vmatprep.mubr.bf16.mxu1 %v680_v24 }
 0x18b   : > { %v591_v30 = vadd.f32 %v2293_v29, %v3002_v32  ;;  %v582_v31 = vpop.f32.mrb[19].mxu0  ;;  %2335 = vmatmul.mubr.bf16.gmra.mrb[12].mxu1 %v681_v23  ;;  %v660_v34 = vmax.f32 %v588_v26, 0.0 }
 0x18c   : > { %v583_v33 = vadd.f32 %v3002_v32, %v582_v31  ;;  %v658_v36 = vmax.f32 %v580_v28, 0.0 }
 0x18d   : > { %v661_v35 = vmax.f32 %v591_v30, 0.0 }
 0x18e   : > { %v659_v37 = vmax.f32 %v583_v33, 0.0 }
 0x18f   : > { %v683_v38 = vpack.c.bf16 %v661_v35, %v660_v34 }
 0x190   : > { %v682_v39 = vpack.c.bf16 %v659_v37, %v658_v36  ;;  %v2296_v40 = vpop.f32.mrb[20].mxu0 }
 0x191   : > { %v604_v41 = vadd.f32 %v2296_v40, %v3002_v32  ;;  %v595_v42 = vpop.f32.mrb[21].mxu0 }
 0x192   : > { %v596_v43 = vadd.f32 %v3002_v32, %v595_v42  ;;  %v2297_v44 = vpop.f32.mrb[22].mxu0  ;;  %2338 = vmatprep.mubr.bf16.mxu1 %v682_v39 }
 0x193   : > { %v607_v45 = vadd.f32 %v2297_v44, %v3002_v32  ;;  %v598_v46 = vpop.f32.mrb[23].mxu0  ;;  %2339 = vmatmul.mubr.bf16.gmra.mrb[16].mxu1 %v683_v38  ;;  %v664_v48 = vmax.f32 %v604_v41, 0.0 }
 0x194   : > { %v599_v47 = vadd.f32 %v3002_v32, %v598_v46  ;;  %v662_v50 = vmax.f32 %v596_v43, 0.0 }
 0x195   : > { %v665_v49 = vmax.f32 %v607_v45, 0.0 }
 0x196   : > { %v663_v51 = vmax.f32 %v599_v47, 0.0 }
 0x197   : > { %v685_v52 = vpack.c.bf16 %v665_v49, %v664_v48 }
 0x198   : > { %v684_v53 = vpack.c.bf16 %v663_v51, %v662_v50  ;;  %v2300_v54 = vpop.f32.mrb[24].mxu0 }
 0x199   : > { %v620_v55 = vadd.f32 %v2300_v54, %v3002_v32  ;;  %v611_v56 = vpop.f32.mrb[25].mxu0 }
 0x19a   : > { %v612_v57 = vadd.f32 %v3002_v32, %v611_v56  ;;  %v2301_v58 = vpop.f32.mrb[26].mxu0  ;;  %2342 = vmatprep.mubr.bf16.mxu1 %v684_v53 }
 0x19b   : > { %v623_v59 = vadd.f32 %v2301_v58, %v3002_v32  ;;  %v614_v60 = vpop.f32.mrb[27].mxu0  ;;  %2343 = vmatmul.mubr.bf16.gmra.mrb[20].mxu1 %v685_v52  ;;  %v668_v62 = vmax.f32 %v620_v55, 0.0 }
 0x19c   : > { %v615_v61 = vadd.f32 %v3002_v32, %v614_v60  ;;  %v666_v0 = vmax.f32 %v612_v57, 0.0 }
 0x19d   : > { %v669_v63 = vmax.f32 %v623_v59, 0.0 }
 0x19e   : > { %v667_v1 = vmax.f32 %v615_v61, 0.0 }
 0x19f   : > { %v687_v2 = vpack.c.bf16 %v669_v63, %v668_v62 }
 0x1a0   : > { %v686_v3 = vpack.c.bf16 %v667_v1, %v666_v0  ;;  %v2304_v4 = vpop.f32.mrb[28].mxu0 }
 0x1a1   : > { %v636_v5 = vadd.f32 %v2304_v4, %v3002_v32  ;;  %v627_v6 = vpop.f32.mrb[29].mxu0 }
 0x1a2   : > { %v628_v7 = vadd.f32 %v3002_v32, %v627_v6  ;;  %v2305_v8 = vpop.f32.mrb[30].mxu0  ;;  %2346 = vmatprep.mubr.bf16.mxu1 %v686_v3 }
 0x1a3   : > { %v639_v9 = vadd.f32 %v2305_v8, %v3002_v32  ;;  %v630_v10 = vpop.f32.mrb[31].mxu0  ;;  %2347 = vmatmul.mubr.bf16.gmra.mrb[24].mxu1 %v687_v2  ;;  %v672_v12 = vmax.f32 %v636_v5, 0.0 }
 0x1a4   : > { %v631_v11 = vadd.f32 %v3002_v32, %v630_v10  ;;  %v670_v14 = vmax.f32 %v628_v7, 0.0 }
 0x1a5   : > { %v673_v13 = vmax.f32 %v639_v9, 0.0 }
 0x1a6   : > { %v671_v15 = vmax.f32 %v631_v11, 0.0 }
 0x1a7   : > { %v689_v16 = vpack.c.bf16 %v673_v13, %v672_v12 }
 0x1a8   : > { %v688_v17 = vpack.c.bf16 %v671_v15, %v670_v14 }
 0x1aa   : > { %2350 = vmatprep.mubr.bf16.mxu1 %v688_v17 }
 0x1ab   : > { %2351 = vmatmul.mubr.bf16.gmra.mrb[28].mxu1 %v689_v16 }
 0x246   : > { %v2324_v19 = vpop.f32.mrb[0].mxu1 }
 0x247   : > { %v804_v20 = vadd.f32 %v2324_v19, %v3039_v18  ;;  %v795_v21 = vpop.f32.mrb[1].mxu1 }
 0x248   : > { %v796_v22 = vadd.f32 %v3039_v18, %v795_v21  ;;  %v2325_v32 = vpop.f32.mrb[2].mxu1 }
 0x249   : > { %924 = vst [vmem:[#allocation2 + $0x10] sm:$0xff] %v804_v20  ;;  %956 = vst [vmem:[#allocation3 + $0x10] sm:$0xff] %v804_v20  ;;  %v807_v23 = vadd.f32 %v2325_v32, %v3039_v18  ;;  %v798_v24 = vpop.f32.mrb[3].mxu1 }
 0x24a   : > { %922 = vst [vmem:[#allocation2] sm:$0xff] %v796_v22  ;;  %954 = vst [vmem:[#allocation3] sm:$0xff] %v796_v22  ;;  %v799_v25 = vadd.f32 %v3039_v18, %v798_v24 }
 0x24b   : > { %925 = vst [vmem:[#allocation2 + $0x18] sm:$0xff] %v807_v23  ;;  %957 = vst [vmem:[#allocation3 + $0x18] sm:$0xff] %v807_v23 }
 0x24c   : > { %923 = vst [vmem:[#allocation2 + $0x8] sm:$0xff] %v799_v25  ;;  %955 = vst [vmem:[#allocation3 + $0x8] sm:$0xff] %v799_v25 }
 0x24e   : > { %v2328_v26 = vpop.f32.mrb[4].mxu1 }
 0x24f   : > { %v820_v27 = vadd.f32 %v2328_v26, %v3039_v18  ;;  %v811_v28 = vpop.f32.mrb[5].mxu1 }
 0x250   : > { %v812_v29 = vadd.f32 %v3039_v18, %v811_v28  ;;  %v2329_v30 = vpop.f32.mrb[6].mxu1 }
 0x251   : > { %928 = vst [vmem:[#allocation2 + $0x30] sm:$0xff] %v820_v27  ;;  %960 = vst [vmem:[#allocation3 + $0x30] sm:$0xff] %v820_v27  ;;  %v823_v31 = vadd.f32 %v2329_v30, %v3039_v18  ;;  %v814_v33 = vpop.f32.mrb[7].mxu1 }
 0x252   : > { %926 = vst [vmem:[#allocation2 + $0x20] sm:$0xff] %v812_v29  ;;  %958 = vst [vmem:[#allocation3 + $0x20] sm:$0xff] %v812_v29  ;;  %v815_v34 = vadd.f32 %v3039_v18, %v814_v33 }
 0x253   : > { %929 = vst [vmem:[#allocation2 + $0x38] sm:$0xff] %v823_v31  ;;  %961 = vst [vmem:[#allocation3 + $0x38] sm:$0xff] %v823_v31 }
 0x254   : > { %927 = vst [vmem:[#allocation2 + $0x28] sm:$0xff] %v815_v34  ;;  %959 = vst [vmem:[#allocation3 + $0x28] sm:$0xff] %v815_v34 }
 0x256   : > { %v2332_v35 = vpop.f32.mrb[8].mxu1 }
 0x257   : > { %v836_v36 = vadd.f32 %v2332_v35, %v3039_v18  ;;  %v827_v37 = vpop.f32.mrb[9].mxu1 }
 0x258   : > { %v828_v38 = vadd.f32 %v3039_v18, %v827_v37  ;;  %v2333_v39 = vpop.f32.mrb[10].mxu1 }
 0x259   : > { %932 = vst [vmem:[#allocation2 + $0x50] sm:$0xff] %v836_v36  ;;  %964 = vst [vmem:[#allocation3 + $0x50] sm:$0xff] %v836_v36  ;;  %v839_v40 = vadd.f32 %v2333_v39, %v3039_v18  ;;  %v830_v41 = vpop.f32.mrb[11].mxu1 }
 0x25a   : > { %930 = vst [vmem:[#allocation2 + $0x40] sm:$0xff] %v828_v38  ;;  %962 = vst [vmem:[#allocation3 + $0x40] sm:$0xff] %v828_v38  ;;  %v831_v42 = vadd.f32 %v3039_v18, %v830_v41 }
 0x25b   : > { %933 = vst [vmem:[#allocation2 + $0x58] sm:$0xff] %v839_v40  ;;  %965 = vst [vmem:[#allocation3 + $0x58] sm:$0xff] %v839_v40 }
 0x25c   : > { %931 = vst [vmem:[#allocation2 + $0x48] sm:$0xff] %v831_v42  ;;  %963 = vst [vmem:[#allocation3 + $0x48] sm:$0xff] %v831_v42 }
 0x25e   : > { %v2336_v43 = vpop.f32.mrb[12].mxu1 }
 0x25f   : > { %v852_v44 = vadd.f32 %v2336_v43, %v3039_v18  ;;  %v843_v45 = vpop.f32.mrb[13].mxu1 }
 0x260   : > { %v844_v46 = vadd.f32 %v3039_v18, %v843_v45  ;;  %v2337_v47 = vpop.f32.mrb[14].mxu1 }
 0x261   : > { %936 = vst [vmem:[#allocation2 + $0x70] sm:$0xff] %v852_v44  ;;  %968 = vst [vmem:[#allocation3 + $0x70] sm:$0xff] %v852_v44  ;;  %v855_v48 = vadd.f32 %v2337_v47, %v3039_v18  ;;  %v846_v49 = vpop.f32.mrb[15].mxu1 }
 0x262   : > { %934 = vst [vmem:[#allocation2 + $0x60] sm:$0xff] %v844_v46  ;;  %966 = vst [vmem:[#allocation3 + $0x60] sm:$0xff] %v844_v46  ;;  %v847_v50 = vadd.f32 %v3039_v18, %v846_v49 }
 0x263   : > { %937 = vst [vmem:[#allocation2 + $0x78] sm:$0xff] %v855_v48  ;;  %969 = vst [vmem:[#allocation3 + $0x78] sm:$0xff] %v855_v48 }
 0x264   : > { %935 = vst [vmem:[#allocation2 + $0x68] sm:$0xff] %v847_v50  ;;  %967 = vst [vmem:[#allocation3 + $0x68] sm:$0xff] %v847_v50 }
 0x266   : > { %v2340_v51 = vpop.f32.mrb[16].mxu1 }
 0x267   : > { %v868_v52 = vadd.f32 %v2340_v51, %v3039_v18  ;;  %v859_v53 = vpop.f32.mrb[17].mxu1 }
 0x268   : > { %v860_v54 = vadd.f32 %v3039_v18, %v859_v53  ;;  %v2341_v55 = vpop.f32.mrb[18].mxu1 }
 0x269   : > { %940 = vst [vmem:[#allocation2 + $0x90] sm:$0xff] %v868_v52  ;;  %972 = vst [vmem:[#allocation3 + $0x90] sm:$0xff] %v868_v52  ;;  %v871_v56 = vadd.f32 %v2341_v55, %v3039_v18  ;;  %v862_v57 = vpop.f32.mrb[19].mxu1 }
 0x26a   : > { %938 = vst [vmem:[#allocation2 + $0x80] sm:$0xff] %v860_v54  ;;  %970 = vst [vmem:[#allocation3 + $0x80] sm:$0xff] %v860_v54  ;;  %v863_v58 = vadd.f32 %v3039_v18, %v862_v57 }
 0x26b   : > { %941 = vst [vmem:[#allocation2 + $0x98] sm:$0xff] %v871_v56  ;;  %973 = vst [vmem:[#allocation3 + $0x98] sm:$0xff] %v871_v56 }
 0x26c   : > { %939 = vst [vmem:[#allocation2 + $0x88] sm:$0xff] %v863_v58  ;;  %971 = vst [vmem:[#allocation3 + $0x88] sm:$0xff] %v863_v58 }
 0x26e   : > { %v2344_v59 = vpop.f32.mrb[20].mxu1 }
 0x26f   : > { %v884_v60 = vadd.f32 %v2344_v59, %v3039_v18  ;;  %v875_v61 = vpop.f32.mrb[21].mxu1 }
 0x270   : > { %v876_v62 = vadd.f32 %v3039_v18, %v875_v61  ;;  %v2345_v63 = vpop.f32.mrb[22].mxu1 }
 0x271   : > { %944 = vst [vmem:[#allocation2 + $0xb0] sm:$0xff] %v884_v60  ;;  %976 = vst [vmem:[#allocation3 + $0xb0] sm:$0xff] %v884_v60  ;;  %v887_v0 = vadd.f32 %v2345_v63, %v3039_v18  ;;  %v878_v1 = vpop.f32.mrb[23].mxu1 }
 0x272   : > { %942 = vst [vmem:[#allocation2 + $0xa0] sm:$0xff] %v876_v62  ;;  %974 = vst [vmem:[#allocation3 + $0xa0] sm:$0xff] %v876_v62  ;;  %v879_v2 = vadd.f32 %v3039_v18, %v878_v1 }
 0x273   : > { %945 = vst [vmem:[#allocation2 + $0xb8] sm:$0xff] %v887_v0  ;;  %977 = vst [vmem:[#allocation3 + $0xb8] sm:$0xff] %v887_v0 }
 0x274   : > { %943 = vst [vmem:[#allocation2 + $0xa8] sm:$0xff] %v879_v2  ;;  %975 = vst [vmem:[#allocation3 + $0xa8] sm:$0xff] %v879_v2 }
 0x276   : > { %v2348_v3 = vpop.f32.mrb[24].mxu1 }
 0x277   : > { %v900_v4 = vadd.f32 %v2348_v3, %v3039_v18  ;;  %v891_v5 = vpop.f32.mrb[25].mxu1 }
 0x278   : > { %v892_v6 = vadd.f32 %v3039_v18, %v891_v5  ;;  %v2349_v7 = vpop.f32.mrb[26].mxu1 }
 0x279   : > { %948 = vst [vmem:[#allocation2 + $0xd0] sm:$0xff] %v900_v4  ;;  %980 = vst [vmem:[#allocation3 + $0xd0] sm:$0xff] %v900_v4  ;;  %v903_v8 = vadd.f32 %v2349_v7, %v3039_v18  ;;  %v894_v9 = vpop.f32.mrb[27].mxu1 }
 0x27a   : > { %946 = vst [vmem:[#allocation2 + $0xc0] sm:$0xff] %v892_v6  ;;  %978 = vst [vmem:[#allocation3 + $0xc0] sm:$0xff] %v892_v6  ;;  %v895_v10 = vadd.f32 %v3039_v18, %v894_v9 }
 0x27b   : > { %949 = vst [vmem:[#allocation2 + $0xd8] sm:$0xff] %v903_v8  ;;  %981 = vst [vmem:[#allocation3 + $0xd8] sm:$0xff] %v903_v8 }
 0x27c   : > { %947 = vst [vmem:[#allocation2 + $0xc8] sm:$0xff] %v895_v10  ;;  %979 = vst [vmem:[#allocation3 + $0xc8] sm:$0xff] %v895_v10 }
 0x27e   : > { %v2352_v11 = vpop.f32.mrb[28].mxu1 }
 0x27f   : > { %v916_v12 = vadd.f32 %v2352_v11, %v3039_v18  ;;  %v907_v13 = vpop.f32.mrb[29].mxu1 }
 0x280   : > { %v908_v14 = vadd.f32 %v3039_v18, %v907_v13  ;;  %v2353_v15 = vpop.f32.mrb[30].mxu1 }
 0x281   : > { %952 = vst [vmem:[#allocation2 + $0xf0] sm:$0xff] %v916_v12  ;;  %984 = vst [vmem:[#allocation3 + $0xf0] sm:$0xff] %v916_v12  ;;  %v919_v16 = vadd.f32 %v2353_v15, %v3039_v18  ;;  %v910_v17 = vpop.f32.mrb[31].mxu1 }
 0x282   : > { %950 = vst [vmem:[#allocation2 + $0xe0] sm:$0xff] %v908_v14  ;;  %982 = vst [vmem:[#allocation3 + $0xe0] sm:$0xff] %v908_v14  ;;  %v911_v19 = vadd.f32 %v3039_v18, %v910_v17 }
 0x283   : > { %953 = vst [vmem:[#allocation2 + $0xf8] sm:$0xff] %v919_v16  ;;  %985 = vst [vmem:[#allocation3 + $0xf8] sm:$0xff] %v919_v16 }
 0x284   : > { %951 = vst [vmem:[#allocation2 + $0xe8] sm:$0xff] %v911_v19  ;;  %983 = vst [vmem:[#allocation3 + $0xe8] sm:$0xff] %v911_v19 }
 0x285 PF: > { %v1034_v20 = vld [vmem:[#allocation3 + $0x80] sm:$0xff]  ;;  %v1035_v21 = vld [vmem:[#allocation3 + $0x88] sm:$0xff]  ;;  %v1036_v24 = vld [vmem:[#allocation3 + $0x90] sm:$0xff]  ;;  %p2093_p7 = scmp.ne.s32.totalorder %s2854_s22, 9 }
 0x286   : > { %v1018_v22 = vld [vmem:[#allocation3] sm:$0xff]  ;;  %v1058_v32 = vpack.c.bf16 %v1035_v21, %v1034_v20  ;;  %v1019_v23 = vld [vmem:[#allocation3 + $0x8] sm:$0xff]  ;;  %v1037_v25 = vld [vmem:[#allocation3 + $0x98] sm:$0xff] }
 0x287   : > { %v1050_v26 = vpack.c.bf16 %v1019_v23, %v1018_v22  ;;  %v1059_v27 = vpack.c.bf16 %v1037_v25, %v1036_v24  ;;  %v1020_v28 = vld [vmem:[#allocation3 + $0x10] sm:$0xff]  ;;  %v1021_v29 = vld [vmem:[#allocation3 + $0x18] sm:$0xff]  ;;  %v1038_v30 = vld [vmem:[#allocation3 + $0xa0] sm:$0xff] }
 0x288   : > { %2146 = vmatprep.subr.bf16.mxu0 %v1058_v32  ;;  %2354 = vmatprep.subr.bf16.mxu1 %v1058_v32  ;;  %v1039_v18 = vld [vmem:[#allocation3 + $0xa8] sm:$0xff]  ;;  %v1051_v31 = vpack.c.bf16 %v1021_v29, %v1020_v28  ;;  %v1022_v34 = vld [vmem:[#allocation3 + $0x20] sm:$0xff]  ;;  %v1040_v36 = vld [vmem:[#allocation3 + $0xb0] sm:$0xff] }
 0x289   : > { %2147 = vmatpush3.bf16.msra.mxu0 %v1050_v26  ;;  %2362 = vmatpush3.bf16.msra.mxu1 %v1050_v26  ;;  %v1060_v33 = vpack.c.bf16 %v1039_v18, %v1038_v30  ;;  %v1023_v35 = vld [vmem:[#allocation3 + $0x28] sm:$0xff]  ;;  %v1041_v37 = vld [vmem:[#allocation3 + $0xb8] sm:$0xff]  ;;  %v1024_v40 = vld [vmem:[#allocation3 + $0x30] sm:$0xff] }
 0x28a   : > { %2148 = vmatprep.subr.bf16.mxu0 %v1059_v27  ;;  %2355 = vmatprep.subr.bf16.mxu1 %v1059_v27  ;;  %v1052_v38 = vpack.c.bf16 %v1023_v35, %v1022_v34  ;;  %v1061_v39 = vpack.c.bf16 %v1041_v37, %v1040_v36  ;;  %v1025_v41 = vld [vmem:[#allocation3 + $0x38] sm:$0xff]  ;;  %v1042_v42 = vld [vmem:[#allocation3 + $0xc0] sm:$0xff]  ;;  %v1043_v43 = vld [vmem:[#allocation3 + $0xc8] sm:$0xff] }
 0x28b   : > { %v1026_v44 = vld [vmem:[#allocation3 + $0x40] sm:$0xff]  ;;  %v1027_v45 = vld [vmem:[#allocation3 + $0x48] sm:$0xff]  ;;  %v1053_v47 = vpack.c.bf16 %v1025_v41, %v1024_v40  ;;  %v1044_v48 = vld [vmem:[#allocation3 + $0xd0] sm:$0xff]  ;;  %v1062_v49 = vpack.c.bf16 %v1043_v43, %v1042_v42 }
 0x28c   : > { %v2466_v46 = vld [vmem:[#allocation10 + $0x4] ss:$8 sps:$4 sm:$0xff]   ;;  %v1045_v51 = vld [vmem:[#allocation3 + $0xd8] sm:$0xff]  ;;  %v1054_v52 = vpack.c.bf16 %v1027_v45, %v1026_v44  ;;  %v1028_v53 = vld [vmem:[#allocation3 + $0x50] sm:$0xff] }
 0x28d   : > { %2149 = vmatpush3.bf16.msra.mxu0 %v1051_v31  ;;  %2363 = vmatpush3.bf16.msra.mxu1 %v1051_v31  ;;  %v2469_v50 = vld [vmem:[#allocation10 + $0x84] ss:$8 sps:$4 sm:$0xff]   ;;  %v1063_v54 = vpack.c.bf16 %v1045_v51, %v1044_v48  ;;  %v1029_v55 = vld [vmem:[#allocation3 + $0x58] sm:$0xff]  ;;  %v1048_v62 = vld [vmem:[#allocation3 + $0xf0] sm:$0xff] }
 0x28e   : > { %2150 = vmatprep.subr.bf16.mxu0 %v1060_v33  ;;  %2356 = vmatprep.subr.bf16.mxu1 %v1060_v33  ;;  %v1046_v56 = vld [vmem:[#allocation3 + $0xe0] sm:$0xff]  ;;  %v1047_v57 = vld [vmem:[#allocation3 + $0xe8] sm:$0xff]  ;;  %v1055_v58 = vpack.c.bf16 %v1029_v55, %v1028_v53  ;;  %v1049_v63 = vld [vmem:[#allocation3 + $0xf8] sm:$0xff] }
 0x28f   : > { %1258 = vmatprep.mubr.bf16.mxu0 %v2466_v46  ;;  %1322 = vmatprep.mubr.bf16.mxu1 %v2469_v50  ;;  %v1030_v59 = vld [vmem:[#allocation3 + $0x60] sm:$0xff]  ;;  %v1031_v60 = vld [vmem:[#allocation3 + $0x68] sm:$0xff]  ;;  %v1064_v61 = vpack.c.bf16 %v1047_v57, %v1046_v56  ;;  %v1032_v1 = vld [vmem:[#allocation3 + $0x70] sm:$0xff]  ;;  %v1065_v2 = vpack.c.bf16 %v1049_v63, %v1048_v62 }
 0x290   : > { %v1056_v0 = vpack.c.bf16 %v1031_v60, %v1030_v59  ;;  %v1033_v3 = vld [vmem:[#allocation3 + $0x78] sm:$0xff]  ;;  %v2464_v5 = vld [vmem:[#allocation10] ss:$8 sps:$4 sm:$0xff]   ;;  %v2476_v11 = vld [vmem:[#allocation10 + $0x24] ss:$8 sps:$4 sm:$0xff]  }
 0x291   : > { %2151 = vmatpush3.bf16.msra.mxu0 %v1052_v38  ;;  %2364 = vmatpush3.bf16.msra.mxu1 %v1052_v38  ;;  %v1057_v4 = vpack.c.bf16 %v1033_v3, %v1032_v1  ;;  %v2467_v6 = vld [vmem:[#allocation10 + $0x80] ss:$8 sps:$4 sm:$0xff]   ;;  %v2470_v7 = vld [vmem:[#allocation10 + $0x14] ss:$8 sps:$4 sm:$0xff]   ;;  %v2474_v9 = vld [vmem:[#allocation10 + $0x10] ss:$8 sps:$4 sm:$0xff]  }
 0x292   : > { %2152 = vmatprep.subr.bf16.mxu0 %v1061_v39  ;;  %2357 = vmatprep.subr.bf16.mxu1 %v1061_v39  ;;  %v2472_v8 = vld [vmem:[#allocation10 + $0x94] ss:$8 sps:$4 sm:$0xff]   ;;  %v2475_v10 = vld [vmem:[#allocation10 + $0x90] ss:$8 sps:$4 sm:$0xff]   ;;  %v2478_v12 = vld [vmem:[#allocation10 + $0xa4] ss:$8 sps:$4 sm:$0xff]  }
 0x293   : > { %v2480_v13 = vld [vmem:[#allocation10 + $0x20] ss:$8 sps:$4 sm:$0xff]   ;;  %v2482_v15 = vld [vmem:[#allocation10 + $0x34] ss:$8 sps:$4 sm:$0xff]   ;;  %v2486_v17 = vld [vmem:[#allocation10 + $0x30] ss:$8 sps:$4 sm:$0xff]  }
 0x294   : > { %v2481_v14 = vld [vmem:[#allocation10 + $0xa0] ss:$8 sps:$4 sm:$0xff]   ;;  %v2484_v16 = vld [vmem:[#allocation10 + $0xb4] ss:$8 sps:$4 sm:$0xff]   ;;  %v2487_v19 = vld [vmem:[#allocation10 + $0xb0] ss:$8 sps:$4 sm:$0xff]  }
 0x295   : > { %2153 = vmatpush3.bf16.msra.mxu0 %v1053_v47  ;;  %2365 = vmatpush3.bf16.msra.mxu1 %v1053_v47  ;;  %v2488_v20 = vld [vmem:[#allocation10 + $0x44] ss:$8 sps:$4 sm:$0xff]   ;;  %v2492_v22 = vld [vmem:[#allocation10 + $0x40] ss:$8 sps:$4 sm:$0xff]   ;;  %v2494_v23 = vld [vmem:[#allocation10 + $0x54] ss:$8 sps:$4 sm:$0xff]  }
 0x296   : > { %2154 = vmatprep.subr.bf16.mxu0 %v1062_v49  ;;  %2358 = vmatprep.subr.bf16.mxu1 %v1062_v49  ;;  %v2490_v21 = vld [vmem:[#allocation10 + $0xc4] ss:$8 sps:$4 sm:$0xff]   ;;  %v2493_v32 = vld [vmem:[#allocation10 + $0xc0] ss:$8 sps:$4 sm:$0xff]   ;;  %v2496_v24 = vld [vmem:[#allocation10 + $0xd4] ss:$8 sps:$4 sm:$0xff]  }
 0x297   : > { %v2498_v25 = vld [vmem:[#allocation10 + $0x50] ss:$8 sps:$4 sm:$0xff]   ;;  %v2500_v27 = vld [vmem:[#allocation10 + $0x64] ss:$8 sps:$4 sm:$0xff]   ;;  %v2504_v29 = vld [vmem:[#allocation10 + $0x60] ss:$8 sps:$4 sm:$0xff]  }
 0x298   : > { %v2499_v26 = vld [vmem:[#allocation10 + $0xd0] ss:$8 sps:$4 sm:$0xff]   ;;  %v2502_v28 = vld [vmem:[#allocation10 + $0xe4] ss:$8 sps:$4 sm:$0xff]   ;;  %v2505_v30 = vld [vmem:[#allocation10 + $0xe0] ss:$8 sps:$4 sm:$0xff]  }
 0x299   : > { %2155 = vmatpush3.bf16.msra.mxu0 %v1054_v52  ;;  %2366 = vmatpush3.bf16.msra.mxu1 %v1054_v52  ;;  %v2506_v18 = vld [vmem:[#allocation10 + $0x74] ss:$8 sps:$4 sm:$0xff]   ;;  %v2510_v33 = vld [vmem:[#allocation10 + $0x70] ss:$8 sps:$4 sm:$0xff]   ;;  %v1419_v35 = vld [vmem:[#allocation2] sm:$0xff] }
 0x29a   : > { %2156 = vmatprep.subr.bf16.mxu0 %v1063_v54  ;;  %2359 = vmatprep.subr.bf16.mxu1 %v1063_v54  ;;  %v2508_v31 = vld [vmem:[#allocation10 + $0xf4] ss:$8 sps:$4 sm:$0xff]   ;;  %v2511_v34 = vld [vmem:[#allocation10 + $0xf0] ss:$8 sps:$4 sm:$0xff]   ;;  %v1435_v36 = vld [vmem:[#allocation2 + $0x80] sm:$0xff] }
 0x29b   : > { %v1420_v39 = vld [vmem:[#allocation2 + $0x8] sm:$0xff]  ;;  %v1451_v44 = vmul.f32 0.1, %v1419_v35  ;;  %v1467_v46 = vmul.f32 0.1, %v1435_v36  ;;  %v1437_v62 = vld [vmem:[#allocation2 + $0x90] sm:$0xff] }
 0x29c   : > { %v1436_v40 = vld [vmem:[#allocation2 + $0x88] sm:$0xff]  ;;  %v1452_v50 = vmul.f32 0.1, %v1420_v39  ;;  %v1422_v3 = vld [vmem:[#allocation2 + $0x18] sm:$0xff] }
 0x29d   : > { %2157 = vmatpush3.bf16.msra.mxu0 %v1055_v58  ;;  %2367 = vmatpush3.bf16.msra.mxu1 %v1055_v58  ;;  %v1468_v52 = vmul.f32 0.1, %v1436_v40 }
 0x29e   : > { %2158 = vmatprep.subr.bf16.mxu0 %v1064_v61  ;;  %2360 = vmatprep.subr.bf16.mxu1 %v1064_v61  ;;  %v1421_v61 = vld [vmem:[#allocation2 + $0x10] sm:$0xff] }
 0x2a1   : > { %2159 = vmatpush3.bf16.msra.mxu0 %v1056_v0  ;;  %2368 = vmatpush3.bf16.msra.mxu1 %v1056_v0 }
 0x2a2   : > { %2160 = vmatprep.subr.bf16.mxu0 %v1065_v2  ;;  %2361 = vmatprep.subr.bf16.mxu1 %v1065_v2 }
 0x2a5   : > { %2161 = vmatpush3.bf16.msra.mxu0 %v1057_v4  ;;  %2369 = vmatpush3.bf16.msra.mxu1 %v1057_v4  ;;  %v1438_v4 = vld [vmem:[#allocation2 + $0x98] sm:$0xff] }
 0x2a8   : > { %1259 = vmatmul.mubr.bf16.vlgmr.msra.gmra.mrb[0].mxu0 %v2464_v5  ;;  %1323 = vmatmul.mubr.bf16.vlgmr.msra.gmra.mrb[0].mxu1 %v2467_v6 }
 0x2a9   : > { %1266 = vmatprep.mubr.bf16.mxu0 %v2470_v7  ;;  %1330 = vmatprep.mubr.bf16.mxu1 %v2472_v8  ;;  %v1453_v8 = vmul.f32 0.1, %v1421_v61  ;;  %v1426_v61 = vld [vmem:[#allocation2 + $0x38] sm:$0xff] }
 0x2b0   : > { %1267 = vmatmul.mubr.bf16.gmra.mrb[4].mxu0 %v2474_v9  ;;  %1331 = vmatmul.mubr.bf16.gmra.mrb[4].mxu1 %v2475_v10  ;;  %v1469_v10 = vmul.f32 0.1, %v1437_v62  ;;  %v1442_v62 = vld [vmem:[#allocation2 + $0xb8] sm:$0xff] }
 0x2b1   : > { %1274 = vmatprep.mubr.bf16.mxu0 %v2476_v11  ;;  %1338 = vmatprep.mubr.bf16.mxu1 %v2478_v12 }
 0x2b8   : > { %1275 = vmatmul.mubr.bf16.gmra.mrb[8].mxu0 %v2480_v13  ;;  %1339 = vmatmul.mubr.bf16.gmra.mrb[8].mxu1 %v2481_v14  ;;  %v1454_v14 = vmul.f32 0.1, %v1422_v3 }
 0x2b9   : > { %1282 = vmatprep.mubr.bf16.mxu0 %v2482_v15  ;;  %1346 = vmatprep.mubr.bf16.mxu1 %v2484_v16  ;;  %v1470_v16 = vmul.f32 0.1, %v1438_v4 }
 0x2c0   : > { %1283 = vmatmul.mubr.bf16.gmra.mrb[12].mxu0 %v2486_v17  ;;  %1347 = vmatmul.mubr.bf16.gmra.mrb[12].mxu1 %v2487_v19 }
 0x2c1   : > { %1290 = vmatprep.mubr.bf16.mxu0 %v2488_v20  ;;  %1354 = vmatprep.mubr.bf16.mxu1 %v2490_v21 }
 0x2c8   : > { %1291 = vmatmul.mubr.bf16.gmra.mrb[16].mxu0 %v2492_v22  ;;  %1355 = vmatmul.mubr.bf16.gmra.mrb[16].mxu1 %v2493_v32 }
 0x2c9   : > { %1298 = vmatprep.mubr.bf16.mxu0 %v2494_v23  ;;  %1362 = vmatprep.mubr.bf16.mxu1 %v2496_v24 }
 0x2d0   : > { %1299 = vmatmul.mubr.bf16.gmra.mrb[20].mxu0 %v2498_v25  ;;  %1363 = vmatmul.mubr.bf16.gmra.mrb[20].mxu1 %v2499_v26  ;;  %v1423_v25 = vld [vmem:[#allocation2 + $0x20] sm:$0xff] }
 0x2d1   : > { %1306 = vmatprep.mubr.bf16.mxu0 %v2500_v27  ;;  %1370 = vmatprep.mubr.bf16.mxu1 %v2502_v28  ;;  %v1439_v26 = vld [vmem:[#allocation2 + $0xa0] sm:$0xff]  ;;  %v1455_v36 = vmul.f32 0.1, %v1423_v25 }
 0x2d8   : > { %1307 = vmatmul.mubr.bf16.gmra.mrb[24].mxu0 %v2504_v29  ;;  %1371 = vmatmul.mubr.bf16.gmra.mrb[24].mxu1 %v2505_v30 }
 0x2d9   : > { %1314 = vmatprep.mubr.bf16.mxu0 %v2506_v18  ;;  %1378 = vmatprep.mubr.bf16.mxu1 %v2508_v31  ;;  %v1424_v18 = vld [vmem:[#allocation2 + $0x28] sm:$0xff] }
 0x2da   : > { %v1440_v31 = vld [vmem:[#allocation2 + $0xa8] sm:$0xff] }
 0x2e0   : > { %1315 = vmatmul.mubr.bf16.gmra.mrb[28].mxu0 %v2510_v33  ;;  %1379 = vmatmul.mubr.bf16.gmra.mrb[28].mxu1 %v2511_v34 }
 0x37b   : > { %v2162_v37 = vpop.f32.mrb[0].mxu0  ;;  %v2210_v38 = vpop.f32.mrb[0].mxu1 }
 0x37c   : > { %v2163_v41 = vpop.f32.mrb[1].mxu0  ;;  %v2211_v42 = vpop.f32.mrb[1].mxu1 }
 0x37d   : > { %v2164_v43 = vadd.f32 %v2163_v41, %v2162_v37  ;;  %v2212_v45 = vadd.f32 %v2211_v42, %v2210_v38  ;;  %v2165_v47 = vpop.f32.mrb[2].mxu0  ;;  %v2213_v48 = vpop.f32.mrb[2].mxu1  ;;  %v1471_v38 = vmul.f32 0.1, %v1439_v26  ;;  %v1456_v42 = vmul.f32 0.1, %v1424_v18 }
 0x37e   : > { %v2166_v49 = vpop.f32.mrb[3].mxu0  ;;  %v2214_v51 = vpop.f32.mrb[3].mxu1  ;;  %v1428_v18 = vld [vmem:[#allocation2 + $0x48] sm:$0xff] }
 0x37f   : > { %v1387_v53 = vmul.f32 0.9, %v2164_v43  ;;  %v1403_v54 = vmul.f32 0.9, %v2212_v45  ;;  %v2167_v55 = vadd.f32 %v2166_v49, %v2165_v47  ;;  %v2215_v56 = vadd.f32 %v2214_v51, %v2213_v48 }
 0x381   : > { %v3073_v57 = vadd.f32 %v1451_v44, %v1387_v53  ;;  %v3075_v58 = vadd.f32 %v1467_v46, %v1403_v54  ;;  %v1388_v59 = vmul.f32 0.9, %v2167_v55  ;;  %v1404_v60 = vmul.f32 0.9, %v2215_v56  ;;  %v1425_v53 = vld [vmem:[#allocation2 + $0x30] sm:$0xff] }
 0x382   : > { %v1472_v44 = vmul.f32 0.1, %v1440_v31  ;;  %v1441_v54 = vld [vmem:[#allocation2 + $0xb0] sm:$0xff]  ;;  %v1457_v4 = vmul.f32 0.1, %v1425_v53  ;;  %v1444_v31 = vld [vmem:[#allocation2 + $0xc8] sm:$0xff] }
 0x383   : > { %1515 = vst [vmem:[#allocation3] sm:$0xff] %v3073_v57  ;;  %1531 = vst [vmem:[#allocation3 + $0x80] sm:$0xff] %v3075_v58  ;;  %v3079_v63 = vadd.f32 %v1452_v50, %v1388_v59  ;;  %v3081_v0 = vadd.f32 %v1468_v52, %v1404_v60  ;;  %v2168_v1 = vpop.f32.mrb[4].mxu0  ;;  %v2216_v2 = vpop.f32.mrb[4].mxu1 }
 0x384   : > { %v2169_v5 = vpop.f32.mrb[5].mxu0  ;;  %v2217_v6 = vpop.f32.mrb[5].mxu1 }
 0x385   : > { %1516 = vst [vmem:[#allocation3 + $0x8] sm:$0xff] %v3079_v63  ;;  %1532 = vst [vmem:[#allocation3 + $0x88] sm:$0xff] %v3081_v0  ;;  %v2170_v7 = vadd.f32 %v2169_v5, %v2168_v1  ;;  %v2218_v9 = vadd.f32 %v2217_v6, %v2216_v2  ;;  %v2171_v11 = vpop.f32.mrb[6].mxu0  ;;  %v2219_v12 = vpop.f32.mrb[6].mxu1  ;;  %v1473_v6 = vmul.f32 0.1, %v1441_v54 }
 0x386   : > { %v2172_v13 = vpop.f32.mrb[7].mxu0  ;;  %v2220_v15 = vpop.f32.mrb[7].mxu1 }
 0x387   : > { %v1389_v17 = vmul.f32 0.9, %v2170_v7  ;;  %v1405_v19 = vmul.f32 0.9, %v2218_v9  ;;  %v2173_v20 = vadd.f32 %v2172_v13, %v2171_v11  ;;  %v2221_v21 = vadd.f32 %v2220_v15, %v2219_v12 }
 0x388   : > { %v1474_v12 = vmul.f32 0.1, %v1442_v62 }
 0x389   : > { %v3085_v22 = vadd.f32 %v1453_v8, %v1389_v17  ;;  %v3087_v32 = vadd.f32 %v1469_v10, %v1405_v19  ;;  %v1390_v23 = vmul.f32 0.9, %v2173_v20  ;;  %v1406_v24 = vmul.f32 0.9, %v2221_v21 }
 0x38a   : > { %v1458_v10 = vmul.f32 0.1, %v1426_v61 }
 0x38b   : > { %1517 = vst [vmem:[#allocation3 + $0x10] sm:$0xff] %v3085_v22  ;;  %1533 = vst [vmem:[#allocation3 + $0x90] sm:$0xff] %v3087_v32  ;;  %v3091_v27 = vadd.f32 %v1454_v14, %v1390_v23  ;;  %v3093_v28 = vadd.f32 %v1470_v16, %v1406_v24  ;;  %v2174_v29 = vpop.f32.mrb[8].mxu0  ;;  %v2222_v30 = vpop.f32.mrb[8].mxu1  ;;  %v1427_v23 = vld [vmem:[#allocation2 + $0x40] sm:$0xff] }
 0x38c   : > { %v2175_v33 = vpop.f32.mrb[9].mxu0  ;;  %v2223_v34 = vpop.f32.mrb[9].mxu1  ;;  %v1443_v24 = vld [vmem:[#allocation2 + $0xc0] sm:$0xff] }
 0x38d   : > { %1518 = vst [vmem:[#allocation3 + $0x18] sm:$0xff] %v3091_v27  ;;  %1534 = vst [vmem:[#allocation3 + $0x98] sm:$0xff] %v3093_v28  ;;  %v2176_v35 = vadd.f32 %v2175_v33, %v2174_v29  ;;  %v2224_v37 = vadd.f32 %v2223_v34, %v2222_v30  ;;  %v2177_v39 = vpop.f32.mrb[10].mxu0  ;;  %v2225_v40 = vpop.f32.mrb[10].mxu1 }
 0x38e   : > { %v2178_v41 = vpop.f32.mrb[11].mxu0  ;;  %v2226_v43 = vpop.f32.mrb[11].mxu1 }
 0x38f   : > { %v1391_v45 = vmul.f32 0.9, %v2176_v35  ;;  %v1407_v46 = vmul.f32 0.9, %v2224_v37  ;;  %v2179_v47 = vadd.f32 %v2178_v41, %v2177_v39  ;;  %v2227_v48 = vadd.f32 %v2226_v43, %v2225_v40 }
 0x391   : > { %v3097_v49 = vadd.f32 %v1455_v36, %v1391_v45  ;;  %v3099_v50 = vadd.f32 %v1471_v38, %v1407_v46  ;;  %v1392_v51 = vmul.f32 0.9, %v2179_v47  ;;  %v1408_v52 = vmul.f32 0.9, %v2227_v48 }
 0x392   : > { %v1459_v36 = vmul.f32 0.1, %v1427_v23  ;;  %v1475_v38 = vmul.f32 0.1, %v1443_v24 }
 0x393   : > { %1519 = vst [vmem:[#allocation3 + $0x20] sm:$0xff] %v3097_v49  ;;  %1535 = vst [vmem:[#allocation3 + $0xa0] sm:$0xff] %v3099_v50  ;;  %v3103_v55 = vadd.f32 %v1456_v42, %v1392_v51  ;;  %v3105_v56 = vadd.f32 %v1472_v44, %v1408_v52  ;;  %v2180_v59 = vpop.f32.mrb[12].mxu0  ;;  %v2228_v60 = vpop.f32.mrb[12].mxu1  ;;  %v1460_v42 = vmul.f32 0.1, %v1428_v18 }
 0x394   : > { %v2181_v1 = vpop.f32.mrb[13].mxu0  ;;  %v2229_v2 = vpop.f32.mrb[13].mxu1  ;;  %v1476_v44 = vmul.f32 0.1, %v1444_v31 }
 0x395   : > { %1520 = vst [vmem:[#allocation3 + $0x28] sm:$0xff] %v3103_v55  ;;  %1536 = vst [vmem:[#allocation3 + $0xa8] sm:$0xff] %v3105_v56  ;;  %v2182_v3 = vadd.f32 %v2181_v1, %v2180_v59  ;;  %v2230_v5 = vadd.f32 %v2229_v2, %v2228_v60  ;;  %v2183_v7 = vpop.f32.mrb[14].mxu0  ;;  %v2231_v8 = vpop.f32.mrb[14].mxu1  ;;  %v1429_v59 = vld [vmem:[#allocation2 + $0x50] sm:$0xff] }
 0x396   : > { %v2184_v9 = vpop.f32.mrb[15].mxu0  ;;  %v2232_v11 = vpop.f32.mrb[15].mxu1  ;;  %v1445_v60 = vld [vmem:[#allocation2 + $0xd0] sm:$0xff] }
 0x397   : > { %v1393_v13 = vmul.f32 0.9, %v2182_v3  ;;  %v1409_v14 = vmul.f32 0.9, %v2230_v5  ;;  %v2185_v15 = vadd.f32 %v2184_v9, %v2183_v7  ;;  %v2233_v16 = vadd.f32 %v2232_v11, %v2231_v8  ;;  %v1430_v3 = vld [vmem:[#allocation2 + $0x58] sm:$0xff] }
 0x398   : > { %v1461_v8 = vmul.f32 0.1, %v1429_v59 }
 0x399   : > { %v3109_v17 = vadd.f32 %v1457_v4, %v1393_v13  ;;  %v3111_v19 = vadd.f32 %v1473_v6, %v1409_v14  ;;  %v1394_v20 = vmul.f32 0.9, %v2185_v15  ;;  %v1410_v21 = vmul.f32 0.9, %v2233_v16  ;;  %v1446_v4 = vld [vmem:[#allocation2 + $0xd8] sm:$0xff] }
 0x39a   : > { %v1462_v14 = vmul.f32 0.1, %v1430_v3  ;;  %v1478_v16 = vmul.f32 0.1, %v1446_v4 }
 0x39b   : > { %1521 = vst [vmem:[#allocation3 + $0x30] sm:$0xff] %v3109_v17  ;;  %1537 = vst [vmem:[#allocation3 + $0xb0] sm:$0xff] %v3111_v19  ;;  %v3115_v25 = vadd.f32 %v1458_v10, %v1394_v20  ;;  %v3117_v26 = vadd.f32 %v1474_v12, %v1410_v21  ;;  %v2186_v29 = vpop.f32.mrb[16].mxu0  ;;  %v2234_v30 = vpop.f32.mrb[16].mxu1  ;;  %v1477_v10 = vmul.f32 0.1, %v1445_v60 }
 0x39c   : > { %v2187_v33 = vpop.f32.mrb[17].mxu0  ;;  %v2235_v34 = vpop.f32.mrb[17].mxu1 }
 0x39d   : > { %1522 = vst [vmem:[#allocation3 + $0x38] sm:$0xff] %v3115_v25  ;;  %1538 = vst [vmem:[#allocation3 + $0xb8] sm:$0xff] %v3117_v26  ;;  %v2188_v35 = vadd.f32 %v2187_v33, %v2186_v29  ;;  %v2236_v37 = vadd.f32 %v2235_v34, %v2234_v30  ;;  %v2189_v39 = vpop.f32.mrb[18].mxu0  ;;  %v2237_v40 = vpop.f32.mrb[18].mxu1  ;;  %v1431_v33 = vld [vmem:[#allocation2 + $0x60] sm:$0xff] }
 0x39e   : > { %v2190_v41 = vpop.f32.mrb[19].mxu0  ;;  %v2238_v43 = vpop.f32.mrb[19].mxu1  ;;  %v1447_v34 = vld [vmem:[#allocation2 + $0xe0] sm:$0xff] }
 0x39f   : > { %v1395_v45 = vmul.f32 0.9, %v2188_v35  ;;  %v1411_v46 = vmul.f32 0.9, %v2236_v37  ;;  %v2191_v47 = vadd.f32 %v2190_v41, %v2189_v39  ;;  %v2239_v48 = vadd.f32 %v2238_v43, %v2237_v40  ;;  %v1432_v39 = vld [vmem:[#allocation2 + $0x68] sm:$0xff] }
 0x3a0   : > { %v1448_v40 = vld [vmem:[#allocation2 + $0xe8] sm:$0xff] }
 0x3a1   : > { %v3121_v51 = vadd.f32 %v1459_v36, %v1395_v45  ;;  %v3123_v52 = vadd.f32 %v1475_v38, %v1411_v46  ;;  %v1396_v53 = vmul.f32 0.9, %v2191_v47  ;;  %v1412_v54 = vmul.f32 0.9, %v2239_v48 }
 0x3a2   : > { %v1479_v46 = vmul.f32 0.1, %v1447_v34  ;;  %v1480_v60 = vmul.f32 0.1, %v1448_v40 }
 0x3a3   : > { %1523 = vst [vmem:[#allocation3 + $0x40] sm:$0xff] %v3121_v51  ;;  %1539 = vst [vmem:[#allocation3 + $0xc0] sm:$0xff] %v3123_v52  ;;  %v3127_v61 = vadd.f32 %v1460_v42, %v1396_v53  ;;  %v3129_v62 = vadd.f32 %v1476_v44, %v1412_v54  ;;  %v2192_v1 = vpop.f32.mrb[20].mxu0  ;;  %v2240_v2 = vpop.f32.mrb[20].mxu1  ;;  %v1463_v44 = vmul.f32 0.1, %v1431_v33 }
 0x3a4   : > { %v2193_v5 = vpop.f32.mrb[21].mxu0  ;;  %v2241_v6 = vpop.f32.mrb[21].mxu1  ;;  %v1464_v54 = vmul.f32 0.1, %v1432_v39 }
 0x3a5   : > { %1524 = vst [vmem:[#allocation3 + $0x48] sm:$0xff] %v3127_v61  ;;  %1540 = vst [vmem:[#allocation3 + $0xc8] sm:$0xff] %v3129_v62  ;;  %v2194_v7 = vadd.f32 %v2193_v5, %v2192_v1  ;;  %v2242_v9 = vadd.f32 %v2241_v6, %v2240_v2  ;;  %v2195_v11 = vpop.f32.mrb[22].mxu0  ;;  %v2243_v12 = vpop.f32.mrb[22].mxu1 }
 0x3a6   : > { %v2196_v13 = vpop.f32.mrb[23].mxu0  ;;  %v2244_v15 = vpop.f32.mrb[23].mxu1 }
 0x3a7   : > { %v1397_v20 = vmul.f32 0.9, %v2194_v7  ;;  %v1413_v21 = vmul.f32 0.9, %v2242_v9  ;;  %v2197_v23 = vadd.f32 %v2196_v13, %v2195_v11  ;;  %v2245_v24 = vadd.f32 %v2244_v15, %v2243_v12  ;;  %v1433_v9 = vld [vmem:[#allocation2 + $0x70] sm:$0xff]  ;;  %v1434_v15 = vld [vmem:[#allocation2 + $0x78] sm:$0xff] }
 0x3a9   : > { %v3133_v29 = vadd.f32 %v1461_v8, %v1397_v20  ;;  %v3135_v30 = vadd.f32 %v1477_v10, %v1413_v21  ;;  %v1398_v18 = vmul.f32 0.9, %v2197_v23  ;;  %v1414_v31 = vmul.f32 0.9, %v2245_v24  ;;  %v1449_v10 = vld [vmem:[#allocation2 + $0xf0] sm:$0xff] }
 0x3aa   : > { %v1465_v24 = vmul.f32 0.1, %v1433_v9 }
 0x3ab   : > { %1525 = vst [vmem:[#allocation3 + $0x50] sm:$0xff] %v3133_v29  ;;  %1541 = vst [vmem:[#allocation3 + $0xd0] sm:$0xff] %v3135_v30  ;;  %v3139_v35 = vadd.f32 %v1462_v14, %v1398_v18  ;;  %v3141_v36 = vadd.f32 %v1478_v16, %v1414_v31  ;;  %v2198_v37 = vpop.f32.mrb[24].mxu0  ;;  %v2246_v38 = vpop.f32.mrb[24].mxu1  ;;  %v1450_v16 = vld [vmem:[#allocation2 + $0xf8] sm:$0xff] }
 0x3ac   : > { %v2199_v41 = vpop.f32.mrb[25].mxu0  ;;  %v2247_v42 = vpop.f32.mrb[25].mxu1  ;;  %v1481_v31 = vmul.f32 0.1, %v1449_v10  ;;  %v1482_v40 = vmul.f32 0.1, %v1450_v16 }
 0x3ad   : > { %1526 = vst [vmem:[#allocation3 + $0x58] sm:$0xff] %v3139_v35  ;;  %1542 = vst [vmem:[#allocation3 + $0xd8] sm:$0xff] %v3141_v36  ;;  %v2200_v43 = vadd.f32 %v2199_v41, %v2198_v37  ;;  %v2248_v45 = vadd.f32 %v2247_v42, %v2246_v38  ;;  %v2201_v47 = vpop.f32.mrb[26].mxu0  ;;  %v2249_v48 = vpop.f32.mrb[26].mxu1  ;;  %v1466_v38 = vmul.f32 0.1, %v1434_v15 }
 0x3ae   : > { %v2202_v53 = vpop.f32.mrb[27].mxu0  ;;  %v2250_v59 = vpop.f32.mrb[27].mxu1 }
 0x3af   : > { %v1399_v1 = vmul.f32 0.9, %v2200_v43  ;;  %v1415_v2 = vmul.f32 0.9, %v2248_v45  ;;  %v2203_v3 = vadd.f32 %v2202_v53, %v2201_v47  ;;  %v2251_v4 = vadd.f32 %v2250_v59, %v2249_v48 }
 0x3b0   : > { %v1551_v59 = vlaneseq (!%p2093_p7) }
 0x3b1   : > { %v3145_v5 = vadd.f32 %v1463_v44, %v1399_v1  ;;  %v3147_v6 = vadd.f32 %v1479_v46, %v1415_v2  ;;  %v1400_v7 = vmul.f32 0.9, %v2203_v3  ;;  %v1416_v8 = vmul.f32 0.9, %v2251_v4 }
 0x3b3   : > { %1527 = vst [vmem:[#allocation3 + $0x60] sm:$0xff] %v3145_v5  ;;  %1543 = vst [vmem:[#allocation3 + $0xe0] sm:$0xff] %v3147_v6  ;;  %v3151_v11 = vadd.f32 %v1464_v54, %v1400_v7  ;;  %v3153_v12 = vadd.f32 %v1480_v60, %v1416_v8  ;;  %v2204_v13 = vpop.f32.mrb[28].mxu0  ;;  %v2252_v14 = vpop.f32.mrb[28].mxu1  ;;  %v3164_v60 = vand.u32 (!%p2093_p7), 127, %v1551_v59 }
 0x3b4   : > { %v2205_v20 = vpop.f32.mrb[29].mxu0  ;;  %v2253_v21 = vpop.f32.mrb[29].mxu1 }
 0x3b5   : > { %1528 = vst [vmem:[#allocation3 + $0x68] sm:$0xff] %v3151_v11  ;;  %1544 = vst [vmem:[#allocation3 + $0xe8] sm:$0xff] %v3153_v12  ;;  %v2206_v23 = vadd.f32 %v2205_v20, %v2204_v13  ;;  %v2254_v18 = vadd.f32 %v2253_v21, %v2252_v14  ;;  %v2207_v33 = vpop.f32.mrb[30].mxu0  ;;  %v2255_v34 = vpop.f32.mrb[30].mxu1  ;;  %vm1553_vm0 = vcmp.lt.s32.totalorder (!%p2093_p7), %v3164_v60, 4 }
 0x3b6   : > { %v2208_v37 = vpop.f32.mrb[31].mxu0  ;;  %v2256_v39 = vpop.f32.mrb[31].mxu1  ;;  %v3170_v1 = vsel (!%p2093_p7), %vm1553_vm0, %v3073_v57, -1e+30  ;;  %v3175_v2 = vsel (!%p2093_p7), %vm1553_vm0, %v3085_v22, -1e+30 }
 0x3b7   : > { %v1401_v41 = vmul.f32 0.9, %v2206_v23  ;;  %v1417_v42 = vmul.f32 0.9, %v2254_v18  ;;  %v2209_v43 = vadd.f32 %v2208_v37, %v2207_v33  ;;  %v2257_v44 = vadd.f32 %v2256_v39, %v2255_v34  ;;  %1550 = sbr.rel (%p2093_p7) target bundleno = 1330 (0x532), region = 68  ;;  %1586 = vmax.xlane.f32.xlu0 (!%p2093_p7), %v3170_v1  ;;  %1590 = vmax.xlane.f32.xlu1 (!%p2093_p7), %v3175_v2 }
 0x3b8   : > { %v3182_v3 = vsel (!%p2093_p7), %vm1553_vm0, %v3079_v63, -1e+30  ;;  %v3187_v4 = vsel (!%p2093_p7), %vm1553_vm0, %v3091_v27, -1e+30  ;;  %v3194_v57 = vsel (!%p2093_p7), %vm1553_vm0, %v3097_v49, -1e+30 }
 0x3b9   : > { %v1497_v45 = vadd.f32 %v1465_v24, %v1401_v41  ;;  %v3157_v46 = vadd.f32 %v1481_v31, %v1417_v42  ;;  %v1402_v47 = vmul.f32 0.9, %v2209_v43  ;;  %v1418_v48 = vmul.f32 0.9, %v2257_v44 }
 0x3ba   : > { %v3199_v22 = vsel (!%p2093_p7), %vm1553_vm0, %v3103_v55, -1e+30  ;;  %v3206_v63 = vsel (!%p2093_p7), %vm1553_vm0, %v3109_v17, -1e+30  ;;  %v3211_v27 = vsel (!%p2093_p7), %vm1553_vm0, %v3115_v25, -1e+30 }
 0x3bb   : > { %1529 = vst [vmem:[#allocation3 + $0x70] sm:$0xff] %v1497_v45  ;;  %1545 = vst [vmem:[#allocation3 + $0xf0] sm:$0xff] %v3157_v46  ;;  %v1498_v53 = vadd.f32 %v1466_v38, %v1402_v47  ;;  %v3160_v54 = vadd.f32 %v1482_v40, %v1418_v48  ;;  %1588 = vmax.xlane.f32.xlu0 (!%p2093_p7), %v3182_v3  ;;  %1592 = vmax.xlane.f32.xlu1 (!%p2093_p7), %v3187_v4  ;;  %v3218_v49 = vsel (!%p2093_p7), %vm1553_vm0, %v3121_v51, -1e+30 }
 0x3bc   : > { %v3223_v55 = vsel (!%p2093_p7), %vm1553_vm0, %v3127_v61, -1e+30  ;;  %v3230_v17 = vsel (!%p2093_p7), %vm1553_vm0, %v3133_v29, -1e+30  ;;  %v3235_v25 = vsel (!%p2093_p7), %vm1553_vm0, %v3139_v35, -1e+30 }
 0x3bd   : > { %1530 = vst [vmem:[#allocation3 + $0x78] sm:$0xff] %v1498_v53  ;;  %1546 = vst [vmem:[#allocation3 + $0xf8] sm:$0xff] %v3160_v54  ;;  %v3242_v51 = vsel (!%p2093_p7), %vm1553_vm0, %v3145_v5, -1e+30  ;;  %v3247_v61 = vsel (!%p2093_p7), %vm1553_vm0, %v3151_v11, -1e+30 }
 0x3be   : > { %v3253_v29 = vsel %vm1553_vm0, %v1497_v45, -1e+30  ;;  %v3257_v35 = vsel %vm1553_vm0, %v1498_v53, -1e+30  ;;  %v3264_v5 = vsel %vm1553_vm0, %v3075_v58, -1e+30 }
 0x3bf   : > { %1594 = vmax.xlane.f32.xlu0 %v3194_v57  ;;  %1596 = vmax.xlane.f32.xlu1 %v3199_v22  ;;  %v3269_v7 = vsel %vm1553_vm0, %v3081_v0, -1e+30  ;;  %v3276_v8 = vsel %vm1553_vm0, %v3087_v32, -1e+30  ;;  %v3281_v9 = vsel %vm1553_vm0, %v3093_v28, -1e+30 }
 0x3c0   : > { %v3288_v58 = vsel %vm1553_vm0, %v3099_v50, -1e+30  ;;  %v3293_v0 = vsel %vm1553_vm0, %v3105_v56, -1e+30  ;;  %v3300_v32 = vsel %vm1553_vm0, %v3111_v19, -1e+30 }
 0x3c1   : > { %v3305_v28 = vsel %vm1553_vm0, %v3117_v26, -1e+30  ;;  %v3312_v50 = vsel %vm1553_vm0, %v3123_v52, -1e+30  ;;  %v3317_v56 = vsel %vm1553_vm0, %v3129_v62, -1e+30 }
 0x3c2   : > { %v3324_v19 = vsel %vm1553_vm0, %v3135_v30, -1e+30  ;;  %v3329_v26 = vsel %vm1553_vm0, %v3141_v36, -1e+30  ;;  %v3336_v52 = vsel %vm1553_vm0, %v3147_v6, -1e+30 }
 0x3c3   : > { %1598 = vmax.xlane.f32.xlu0 %v3206_v63  ;;  %1600 = vmax.xlane.f32.xlu1 %v3211_v27  ;;  %v3341_v62 = vsel %vm1553_vm0, %v3153_v12, -1e+30  ;;  %v3348_v30 = vsel %vm1553_vm0, %v3157_v46, -1e+30  ;;  %v3353_v36 = vsel %vm1553_vm0, %v3160_v54, -1e+30 }
 0x3c7   : > { %1602 = vmax.xlane.f32.xlu0 %v3218_v49  ;;  %1604 = vmax.xlane.f32.xlu1 %v3223_v55 }
 0x3cb   : > { %1606 = vmax.xlane.f32.xlu0 %v3230_v17  ;;  %1608 = vmax.xlane.f32.xlu1 %v3235_v25 }
 0x3cf   : > { %1610 = vmax.xlane.f32.xlu0 %v3242_v51  ;;  %1612 = vmax.xlane.f32.xlu1 %v3247_v61 }
 0x3d3   : > { %1614 = vmax.xlane.f32.xlu0 %v3253_v29  ;;  %1616 = vmax.xlane.f32.xlu1 %v3257_v35 }
 0x3d7   : > { %1618 = vmax.xlane.f32.xlu0 %v3264_v5  ;;  %1620 = vmax.xlane.f32.xlu1 %v3269_v7 }
 0x3db   : > { %1622 = vmax.xlane.f32.xlu0 %v3276_v8  ;;  %1624 = vmax.xlane.f32.xlu1 %v3281_v9 }
 0x3df   : > { %1626 = vmax.xlane.f32.xlu0 %v3288_v58  ;;  %1628 = vmax.xlane.f32.xlu1 %v3293_v0 }
 0x3e3   : > { %1630 = vmax.xlane.f32.xlu0 %v3300_v32  ;;  %1632 = vmax.xlane.f32.xlu1 %v3305_v28 }
 0x3e7   : > { %1634 = vmax.xlane.f32.xlu0 %v3312_v50  ;;  %1636 = vmax.xlane.f32.xlu1 %v3317_v56 }
 0x3eb   : > { %1638 = vmax.xlane.f32.xlu0 %v3324_v19  ;;  %1640 = vmax.xlane.f32.xlu1 %v3329_v26 }
 0x3ef   : > { %1642 = vmax.xlane.f32.xlu0 %v3336_v52  ;;  %1644 = vmax.xlane.f32.xlu1 %v3341_v62 }
 0x3f3   : > { %1646 = vmax.xlane.f32.xlu0 %v3348_v30  ;;  %1648 = vmax.xlane.f32.xlu1 %v3353_v36 }
 0x444   : > { %v1587_v6 = vpop.xlane.xlu0 %1586  ;;  %v1591_v10 = vpop.xlane.xlu1 %1590 }
 0x445   : > { %v3358_v11 = vsub.f32 %v3170_v1, %v1587_v6  ;;  %v3361_v12 = vsub.f32 %v3175_v2, %v1591_v10 }
 0x447   : > { %v1682_v13 = vmul.f32 1.442695, %v3358_v11  ;;  %v1686_v14 = vmul.f32 1.442695, %v3361_v12 }
 0x448   : > { %v1589_v15 = vpop.xlane.xlu0 %1588  ;;  %v1593_v16 = vpop.xlane.xlu1 %1592 }
 0x449   : > { %2512 = vpow2.f32 %v1682_v13  ;;  %v3366_v20 = vsub.f32 %v3182_v3, %v1589_v15  ;;  %v3369_v21 = vsub.f32 %v3187_v4, %v1593_v16 }
 0x44a   : > { %2514 = vpow2.f32 %v1686_v14 }
 0x44b   : > { %v1684_v23 = vmul.f32 1.442695, %v3366_v20  ;;  %v1688_v24 = vmul.f32 1.442695, %v3369_v21 }
 0x44c   : > { %v1595_v18 = vpop.xlane.xlu0 %1594  ;;  %v1597_v31 = vpop.xlane.xlu1 %1596 }
 0x44d   : > { %2516 = vpow2.f32 %v1684_v23  ;;  %v3374_v33 = vsub.f32 %v3194_v57, %v1595_v18  ;;  %v3377_v34 = vsub.f32 %v3199_v22, %v1597_v31 }
 0x44e   : > { %2518 = vpow2.f32 %v1688_v24 }
 0x44f   : > { %v1690_v37 = vmul.f32 1.442695, %v3374_v33  ;;  %v1692_v38 = vmul.f32 1.442695, %v3377_v34 }
 0x450   : > { %v1599_v39 = vpop.xlane.xlu0 %1598  ;;  %v1601_v40 = vpop.xlane.xlu1 %1600 }
 0x451   : > { %2520 = vpow2.f32 %v1690_v37  ;;  %v3382_v41 = vsub.f32 %v3206_v63, %v1599_v39  ;;  %v3385_v42 = vsub.f32 %v3211_v27, %v1601_v40 }
 0x452   : > { %2522 = vpow2.f32 %v1692_v38 }
 0x453   : > { %v2513_v43 = vpop.eup %2512  ;;  %v1694_v44 = vmul.f32 1.442695, %v3382_v41  ;;  %v1696_v45 = vmul.f32 1.442695, %v3385_v42 }
 0x454   : > { %1746 = vadd.xlane.f32.xlu0 %v2513_v43  ;;  %v1603_v46 = vpop.xlane.xlu0 %1602  ;;  %v1605_v47 = vpop.xlane.xlu1 %1604 }
 0x455   : > { %v2515_v48 = vpop.eup %2514  ;;  %2524 = vpow2.f32 %v1694_v44  ;;  %v3390_v53 = vsub.f32 %v3218_v49, %v1603_v46  ;;  %v3393_v54 = vsub.f32 %v3223_v55, %v1605_v47 }
 0x456   : > { %2526 = vpow2.f32 %v1696_v45 }
 0x457   : > { %v2517_v59 = vpop.eup %2516  ;;  %v1698_v60 = vmul.f32 1.442695, %v3390_v53  ;;  %v1700_v1 = vmul.f32 1.442695, %v3393_v54 }
 0x458   : > { %1750 = vadd.xlane.f32.xlu0 %v2515_v48  ;;  %1748 = vadd.xlane.f32.xlu1 %v2517_v59  ;;  %v1607_v2 = vpop.xlane.xlu0 %1606  ;;  %v1609_v3 = vpop.xlane.xlu1 %1608 }
 0x459   : > { %v2519_v4 = vpop.eup %2518  ;;  %2528 = vpow2.f32 %v1698_v60  ;;  %v3398_v57 = vsub.f32 %v3230_v17, %v1607_v2  ;;  %v3401_v22 = vsub.f32 %v3235_v25, %v1609_v3 }
 0x45a   : > { %2530 = vpow2.f32 %v1700_v1 }
 0x45b   : > { %v2521_v63 = vpop.eup %2520  ;;  %v1702_v27 = vmul.f32 1.442695, %v3398_v57  ;;  %v1704_v49 = vmul.f32 1.442695, %v3401_v22 }
 0x45c   : > { %1752 = vadd.xlane.f32.xlu1 %v2519_v4  ;;  %1754 = vadd.xlane.f32.xlu0 %v2521_v63  ;;  %v1611_v55 = vpop.xlane.xlu0 %1610  ;;  %v1613_v6 = vpop.xlane.xlu1 %1612 }
 0x45d   : > { %v2523_v10 = vpop.eup %2522  ;;  %2532 = vpow2.f32 %v1702_v27  ;;  %v3406_v13 = vsub.f32 %v3242_v51, %v1611_v55  ;;  %v3409_v17 = vsub.f32 %v3247_v61, %v1613_v6 }
 0x45e   : > { %2534 = vpow2.f32 %v1704_v49 }
 0x45f   : > { %v2525_v25 = vpop.eup %2524  ;;  %v1706_v14 = vmul.f32 1.442695, %v3406_v13  ;;  %v1708_v15 = vmul.f32 1.442695, %v3409_v17 }
 0x460   : > { %1756 = vadd.xlane.f32.xlu1 %v2523_v10  ;;  %1758 = vadd.xlane.f32.xlu0 %v2525_v25  ;;  %v1615_v16 = vpop.xlane.xlu0 %1614  ;;  %v1617_v23 = vpop.xlane.xlu1 %1616 }
 0x461   : > { %v2527_v24 = vpop.eup %2526  ;;  %2536 = vpow2.f32 %v1706_v14  ;;  %v3414_v18 = vsub.f32 %v3253_v29, %v1615_v16  ;;  %v3417_v51 = vsub.f32 %v3257_v35, %v1617_v23 }
 0x462   : > { %2538 = vpow2.f32 %v1708_v15 }
 0x463   : > { %v2529_v61 = vpop.eup %2528  ;;  %v1710_v31 = vmul.f32 1.442695, %v3414_v18  ;;  %v1712_v37 = vmul.f32 1.442695, %v3417_v51 }
 0x464   : > { %1760 = vadd.xlane.f32.xlu1 %v2527_v24  ;;  %1762 = vadd.xlane.f32.xlu0 %v2529_v61  ;;  %v1619_v38 = vpop.xlane.xlu0 %1618  ;;  %v1621_v39 = vpop.xlane.xlu1 %1620 }
 0x465   : > { %v2531_v40 = vpop.eup %2530  ;;  %2540 = vpow2.f32 %v1710_v31  ;;  %v3422_v43 = vsub.f32 %v3264_v5, %v1619_v38  ;;  %v3425_v29 = vsub.f32 %v3269_v7, %v1621_v39 }
 0x466   : > { %2542 = vpow2.f32 %v1712_v37 }
 0x467   : > { %v2533_v35 = vpop.eup %2532  ;;  %v1714_v44 = vmul.f32 1.442695, %v3422_v43  ;;  %v1716_v45 = vmul.f32 1.442695, %v3425_v29 }
 0x468   : > { %1764 = vadd.xlane.f32.xlu1 %v2531_v40  ;;  %1766 = vadd.xlane.f32.xlu0 %v2533_v35  ;;  %v1623_v46 = vpop.xlane.xlu0 %1622  ;;  %v1625_v47 = vpop.xlane.xlu1 %1624 }
 0x469   : > { %v2535_v48 = vpop.eup %2534  ;;  %2544 = vpow2.f32 %v1714_v44  ;;  %v3430_v59 = vsub.f32 %v3276_v8, %v1623_v46  ;;  %v3433_v5 = vsub.f32 %v3281_v9, %v1625_v47 }
 0x46a   : > { %2546 = vpow2.f32 %v1716_v45 }
 0x46b   : > { %v2537_v7 = vpop.eup %2536  ;;  %v1718_v60 = vmul.f32 1.442695, %v3430_v59  ;;  %v1720_v1 = vmul.f32 1.442695, %v3433_v5 }
 0x46c   : > { %1768 = vadd.xlane.f32.xlu1 %v2535_v48  ;;  %1770 = vadd.xlane.f32.xlu0 %v2537_v7  ;;  %v1627_v2 = vpop.xlane.xlu0 %1626  ;;  %v1629_v3 = vpop.xlane.xlu1 %1628 }
 0x46d   : > { %v2539_v4 = vpop.eup %2538  ;;  %2548 = vpow2.f32 %v1718_v60  ;;  %v3438_v63 = vsub.f32 %v3288_v58, %v1627_v2  ;;  %v3441_v8 = vsub.f32 %v3293_v0, %v1629_v3 }
 0x46e   : > { %2550 = vpow2.f32 %v1720_v1 }
 0x46f   : > { %v2541_v9 = vpop.eup %2540  ;;  %v1722_v27 = vmul.f32 1.442695, %v3438_v63  ;;  %v1724_v49 = vmul.f32 1.442695, %v3441_v8 }
 0x470   : > { %1772 = vadd.xlane.f32.xlu1 %v2539_v4  ;;  %1774 = vadd.xlane.f32.xlu0 %v2541_v9  ;;  %v1631_v55 = vpop.xlane.xlu0 %1630  ;;  %v1633_v6 = vpop.xlane.xlu1 %1632 }
 0x471   : > { %v2543_v10 = vpop.eup %2542  ;;  %2552 = vpow2.f32 %v1722_v27  ;;  %v3446_v25 = vsub.f32 %v3300_v32, %v1631_v55  ;;  %v3449_v58 = vsub.f32 %v3305_v28, %v1633_v6 }
 0x472   : > { %2554 = vpow2.f32 %v1724_v49 }
 0x473   : > { %v2545_v0 = vpop.eup %2544  ;;  %v1726_v14 = vmul.f32 1.442695, %v3446_v25  ;;  %v1728_v15 = vmul.f32 1.442695, %v3449_v58 }
 0x474   : > { %1776 = vadd.xlane.f32.xlu1 %v2543_v10  ;;  %1778 = vadd.xlane.f32.xlu0 %v2545_v0  ;;  %v1635_v16 = vpop.xlane.xlu0 %1634  ;;  %v1637_v23 = vpop.xlane.xlu1 %1636 }
 0x475   : > { %v2547_v24 = vpop.eup %2546  ;;  %2556 = vpow2.f32 %v1726_v14  ;;  %v3454_v61 = vsub.f32 %v3312_v50, %v1635_v16  ;;  %v3457_v32 = vsub.f32 %v3317_v56, %v1637_v23 }
 0x476   : > { %2558 = vpow2.f32 %v1728_v15 }
 0x477   : > { %v2549_v28 = vpop.eup %2548  ;;  %v1730_v31 = vmul.f32 1.442695, %v3454_v61  ;;  %v1732_v37 = vmul.f32 1.442695, %v3457_v32 }
 0x478   : > { %1780 = vadd.xlane.f32.xlu1 %v2547_v24  ;;  %1782 = vadd.xlane.f32.xlu0 %v2549_v28  ;;  %v1639_v38 = vpop.xlane.xlu0 %1638  ;;  %v1641_v39 = vpop.xlane.xlu1 %1640 }
 0x479   : > { %v2551_v40 = vpop.eup %2550  ;;  %2560 = vpow2.f32 %v1730_v31  ;;  %v3462_v35 = vsub.f32 %v3324_v19, %v1639_v38  ;;  %v3465_v50 = vsub.f32 %v3329_v26, %v1641_v39 }
 0x47a   : > { %2562 = vpow2.f32 %v1732_v37 }
 0x47b   : > { %v2553_v56 = vpop.eup %2552  ;;  %v1734_v44 = vmul.f32 1.442695, %v3462_v35  ;;  %v1736_v45 = vmul.f32 1.442695, %v3465_v50 }
 0x47c   : > { %1784 = vadd.xlane.f32.xlu1 %v2551_v40  ;;  %1786 = vadd.xlane.f32.xlu0 %v2553_v56  ;;  %v1643_v46 = vpop.xlane.xlu0 %1642  ;;  %v1645_v47 = vpop.xlane.xlu1 %1644 }
 0x47d   : > { %v2555_v48 = vpop.eup %2554  ;;  %2564 = vpow2.f32 %v1734_v44  ;;  %v3470_v7 = vsub.f32 %v3336_v52, %v1643_v46  ;;  %v3473_v19 = vsub.f32 %v3341_v62, %v1645_v47 }
 0x47e   : > { %2566 = vpow2.f32 %v1736_v45 }
 0x47f   : > { %v2557_v26 = vpop.eup %2556  ;;  %v1738_v60 = vmul.f32 1.442695, %v3470_v7  ;;  %v1740_v1 = vmul.f32 1.442695, %v3473_v19 }
 0x480   : > { %1788 = vadd.xlane.f32.xlu1 %v2555_v48  ;;  %1790 = vadd.xlane.f32.xlu0 %v2557_v26  ;;  %v1647_v2 = vpop.xlane.xlu0 %1646  ;;  %v1649_v3 = vpop.xlane.xlu1 %1648 }
 0x481   : > { %v2559_v4 = vpop.eup %2558  ;;  %2568 = vpow2.f32 %v1738_v60  ;;  %v3478_v9 = vsub.f32 %v3348_v30, %v1647_v2  ;;  %v3481_v52 = vsub.f32 %v3353_v36, %v1649_v3 }
 0x482   : > { %2570 = vpow2.f32 %v1740_v1 }
 0x483   : > { %v2561_v62 = vpop.eup %2560  ;;  %v1742_v27 = vmul.f32 1.442695, %v3478_v9  ;;  %v1744_v49 = vmul.f32 1.442695, %v3481_v52 }
 0x484   : > { %1792 = vadd.xlane.f32.xlu1 %v2559_v4  ;;  %1794 = vadd.xlane.f32.xlu0 %v2561_v62  ;;  %v2563_v55 = vpop.eup %2562 }
 0x485   : > { %2572 = vpow2.f32 %v1742_v27 }
 0x486   : > { %2574 = vpow2.f32 %v1744_v49 }
 0x487   : > { %v2565_v6 = vpop.eup %2564 }
 0x488   : > { %1796 = vadd.xlane.f32.xlu1 %v2563_v55  ;;  %1798 = vadd.xlane.f32.xlu0 %v2565_v6  ;;  %v2567_v10 = vpop.eup %2566 }
 0x48b   : > { %v2569_v30 = vpop.eup %2568 }
 0x48c   : > { %1800 = vadd.xlane.f32.xlu1 %v2567_v10  ;;  %1802 = vadd.xlane.f32.xlu0 %v2569_v30  ;;  %v2571_v36 = vpop.eup %2570 }
 0x48f   : > { %v2573_v0 = vpop.eup %2572 }
 0x490   : > { %1804 = vadd.xlane.f32.xlu1 %v2571_v36  ;;  %1806 = vadd.xlane.f32.xlu0 %v2573_v0  ;;  %v2575_v14 = vpop.eup %2574 }
 0x494   : > { %1808 = vadd.xlane.f32.xlu1 %v2575_v14 }
 0x4e1   : > { %v1747_v15 = vpop.xlane.xlu0 %1746 }
 0x4e2   : > { %2576 = vlog2.f32 %v1747_v15 }
 0x4e5   : > { %v1749_v16 = vpop.xlane.xlu1 %1748  ;;  %v1751_v23 = vpop.xlane.xlu0 %1750 }
 0x4e6   : > { %2578 = vlog2.f32 %v1749_v16 }
 0x4e7   : > { %2580 = vlog2.f32 %v1751_v23 }
 0x4e9   : > { %v1753_v24 = vpop.xlane.xlu1 %1752  ;;  %v1755_v28 = vpop.xlane.xlu0 %1754 }
 0x4ea   : > { %2582 = vlog2.f32 %v1753_v24 }
 0x4eb   : > { %2584 = vlog2.f32 %v1755_v28 }
 0x4ec   : > { %v2577_v31 = vpop.eup %2576 }
 0x4ed   : > { %v1811_v37 = vmul.f32 0.6931472, %v2577_v31  ;;  %v1757_v38 = vpop.xlane.xlu1 %1756  ;;  %v1759_v39 = vpop.xlane.xlu0 %1758 }
 0x4ee   : > { %2586 = vlog2.f32 %v1757_v38 }
 0x4ef   : > { %v1874_v40 = vsub.f32 %v3358_v11, %v1811_v37  ;;  %2588 = vlog2.f32 %v1759_v39 }
 0x4f0   : > { %v2579_v56 = vpop.eup %2578 }
 0x4f1   : > { %v2581_v44 = vpop.eup %2580  ;;  %1906 = vst [vmem:[#allocation12] sm:$0xff] %v1874_v40  ;;  %v1813_v45 = vmul.f32 0.6931472, %v2579_v56  ;;  %v1761_v46 = vpop.xlane.xlu1 %1760 }
 0x4f2   : > { %v1763_v47 = vpop.xlane.xlu0 %1762  ;;  %v1815_v48 = vmul.f32 0.6931472, %v2581_v44  ;;  %2590 = vlog2.f32 %v1761_v46 }
 0x4f3   : > { %v1875_v26 = vsub.f32 %v3366_v20, %v1813_v45  ;;  %2592 = vlog2.f32 %v1763_v47 }
 0x4f4   : > { %v2583_v60 = vpop.eup %2582  ;;  %v1876_v1 = vsub.f32 %v3361_v12, %v1815_v48 }
 0x4f5   : > { %v2585_v2 = vpop.eup %2584  ;;  %1907 = vst [vmem:[#allocation12 + $0x8] sm:$0xff] %v1875_v26  ;;  %v1817_v3 = vmul.f32 0.6931472, %v2583_v60  ;;  %v1765_v4 = vpop.xlane.xlu1 %1764 }
 0x4f6   : > { %v1767_v11 = vpop.xlane.xlu0 %1766  ;;  %1908 = vst [vmem:[#allocation12 + $0x10] sm:$0xff] %v1876_v1  ;;  %v1819_v62 = vmul.f32 0.6931472, %v2585_v2  ;;  %2594 = vlog2.f32 %v1765_v4 }
 0x4f7   : > { %v1877_v27 = vsub.f32 %v3369_v21, %v1817_v3  ;;  %2596 = vlog2.f32 %v1767_v11 }
 0x4f8   : > { %v2587_v49 = vpop.eup %2586  ;;  %v1878_v55 = vsub.f32 %v3374_v33, %v1819_v62 }
 0x4f9   : > { %v2589_v6 = vpop.eup %2588  ;;  %1909 = vst [vmem:[#allocation12 + $0x18] sm:$0xff] %v1877_v27  ;;  %v1821_v20 = vmul.f32 0.6931472, %v2587_v49  ;;  %v1769_v10 = vpop.xlane.xlu1 %1768 }
 0x4fa   : > { %v1771_v30 = vpop.xlane.xlu0 %1770  ;;  %1910 = vst [vmem:[#allocation12 + $0x20] sm:$0xff] %v1878_v55  ;;  %v1823_v12 = vmul.f32 0.6931472, %v2589_v6  ;;  %2598 = vlog2.f32 %v1769_v10 }
 0x4fb   : > { %v1879_v36 = vsub.f32 %v3377_v34, %v1821_v20  ;;  %2600 = vlog2.f32 %v1771_v30 }
 0x4fc   : > { %v2591_v0 = vpop.eup %2590  ;;  %v1880_v14 = vsub.f32 %v3382_v41, %v1823_v12 }
 0x4fd   : > { %v2593_v15 = vpop.eup %2592  ;;  %1911 = vst [vmem:[#allocation12 + $0x28] sm:$0xff] %v1879_v36  ;;  %v1825_v21 = vmul.f32 0.6931472, %v2591_v0  ;;  %v1773_v16 = vpop.xlane.xlu1 %1772 }
 0x4fe   : > { %v1775_v23 = vpop.xlane.xlu0 %1774  ;;  %1912 = vst [vmem:[#allocation12 + $0x30] sm:$0xff] %v1880_v14  ;;  %v1827_v33 = vmul.f32 0.6931472, %v2593_v15  ;;  %2602 = vlog2.f32 %v1773_v16 }
 0x4ff   : > { %v1881_v24 = vsub.f32 %v3385_v42, %v1825_v21  ;;  %2604 = vlog2.f32 %v1775_v23 }
 0x500   : > { %v2595_v28 = vpop.eup %2594  ;;  %v1882_v31 = vsub.f32 %v3390_v53, %v1827_v33 }
 0x501   : > { %v2597_v37 = vpop.eup %2596  ;;  %1913 = vst [vmem:[#allocation12 + $0x38] sm:$0xff] %v1881_v24  ;;  %v1829_v34 = vmul.f32 0.6931472, %v2595_v28  ;;  %v1777_v38 = vpop.xlane.xlu1 %1776 }
 0x502   : > { %v1779_v39 = vpop.xlane.xlu0 %1778  ;;  %1914 = vst [vmem:[#allocation12 + $0x40] sm:$0xff] %v1882_v31  ;;  %v1831_v41 = vmul.f32 0.6931472, %v2597_v37  ;;  %2606 = vlog2.f32 %v1777_v38 }
 0x503   : > { %v1883_v40 = vsub.f32 %v3393_v54, %v1829_v34  ;;  %2608 = vlog2.f32 %v1779_v39 }
 0x504   : > { %v2599_v56 = vpop.eup %2598  ;;  %v1884_v44 = vsub.f32 %v3398_v57, %v1831_v41 }
 0x505   : > { %v2601_v45 = vpop.eup %2600  ;;  %1915 = vst [vmem:[#allocation12 + $0x48] sm:$0xff] %v1883_v40  ;;  %v1833_v42 = vmul.f32 0.6931472, %v2599_v56  ;;  %v1781_v46 = vpop.xlane.xlu1 %1780 }
 0x506   : > { %v1783_v47 = vpop.xlane.xlu0 %1782  ;;  %1916 = vst [vmem:[#allocation12 + $0x50] sm:$0xff] %v1884_v44  ;;  %v1835_v53 = vmul.f32 0.6931472, %v2601_v45  ;;  %2610 = vlog2.f32 %v1781_v46 }
 0x507   : > { %v1885_v48 = vsub.f32 %v3401_v22, %v1833_v42  ;;  %2612 = vlog2.f32 %v1783_v47 }
 0x508   : > { %v2603_v26 = vpop.eup %2602  ;;  %v1886_v60 = vsub.f32 %v3406_v13, %v1835_v53 }
 0x509   : > { %v2605_v1 = vpop.eup %2604  ;;  %1917 = vst [vmem:[#allocation12 + $0x58] sm:$0xff] %v1885_v48  ;;  %v1837_v54 = vmul.f32 0.6931472, %v2603_v26  ;;  %v1785_v2 = vpop.xlane.xlu1 %1784 }
 0x50a   : > { %v1787_v3 = vpop.xlane.xlu0 %1786  ;;  %1918 = vst [vmem:[#allocation12 + $0x60] sm:$0xff] %v1886_v60  ;;  %v1839_v57 = vmul.f32 0.6931472, %v2605_v1  ;;  %2614 = vlog2.f32 %v1785_v2 }
 0x50b   : > { %v1887_v4 = vsub.f32 %v3409_v17, %v1837_v54  ;;  %2616 = vlog2.f32 %v1787_v3 }
 0x50c   : > { %v2607_v11 = vpop.eup %2606  ;;  %v1888_v62 = vsub.f32 %v3414_v18, %v1839_v57 }
 0x50d   : > { %v2609_v27 = vpop.eup %2608  ;;  %1919 = vst [vmem:[#allocation12 + $0x68] sm:$0xff] %v1887_v4  ;;  %v1841_v22 = vmul.f32 0.6931472, %v2607_v11  ;;  %v1789_v49 = vpop.xlane.xlu1 %1788 }
 0x50e   : > { %v1791_v55 = vpop.xlane.xlu0 %1790  ;;  %1920 = vst [vmem:[#allocation12 + $0x70] sm:$0xff] %v1888_v62  ;;  %v1843_v13 = vmul.f32 0.6931472, %v2609_v27  ;;  %2618 = vlog2.f32 %v1789_v49 }
 0x50f   : > { %v1889_v6 = vsub.f32 %v3417_v51, %v1841_v22  ;;  %2620 = vlog2.f32 %v1791_v55 }
 0x510   : > { %v2611_v20 = vpop.eup %2610  ;;  %v1890_v10 = vsub.f32 %v3422_v43, %v1843_v13 }
 0x511   : > { %v2613_v30 = vpop.eup %2612  ;;  %1921 = vst [vmem:[#allocation12 + $0x78] sm:$0xff] %v1889_v6  ;;  %v1845_v17 = vmul.f32 0.6931472, %v2611_v20  ;;  %v1793_v12 = vpop.xlane.xlu1 %1792 }
 0x512   : > { %v1795_v36 = vpop.xlane.xlu0 %1794  ;;  %1922 = vst [vmem:[#allocation12 + $0x80] sm:$0xff] %v1890_v10  ;;  %v1847_v18 = vmul.f32 0.6931472, %v2613_v30  ;;  %2622 = vlog2.f32 %v1793_v12 }
 0x513   : > { %v1891_v0 = vsub.f32 %v3425_v29, %v1845_v17  ;;  %2624 = vlog2.f32 %v1795_v36 }
 0x514   : > { %v2615_v14 = vpop.eup %2614  ;;  %v1892_v15 = vsub.f32 %v3430_v59, %v1847_v18 }
 0x515   : > { %v2617_v21 = vpop.eup %2616  ;;  %1923 = vst [vmem:[#allocation12 + $0x88] sm:$0xff] %v1891_v0  ;;  %v1849_v51 = vmul.f32 0.6931472, %v2615_v14  ;;  %v1797_v16 = vpop.xlane.xlu1 %1796 }
 0x516   : > { %v1799_v23 = vpop.xlane.xlu0 %1798  ;;  %1924 = vst [vmem:[#allocation12 + $0x90] sm:$0xff] %v1892_v15  ;;  %v1851_v43 = vmul.f32 0.6931472, %v2617_v21  ;;  %2626 = vlog2.f32 %v1797_v16 }
 0x517   : > { %v1893_v33 = vsub.f32 %v3433_v5, %v1849_v51  ;;  %2628 = vlog2.f32 %v1799_v23 }
 0x518   : > { %v2619_v24 = vpop.eup %2618  ;;  %v1894_v28 = vsub.f32 %v3438_v63, %v1851_v43 }
 0x519   : > { %v2621_v31 = vpop.eup %2620  ;;  %1925 = vst [vmem:[#allocation12 + $0x98] sm:$0xff] %v1893_v33  ;;  %v1853_v29 = vmul.f32 0.6931472, %v2619_v24  ;;  %v1801_v37 = vpop.xlane.xlu1 %1800 }
 0x51a   : > { %v1803_v34 = vpop.xlane.xlu0 %1802  ;;  %1926 = vst [vmem:[#allocation12 + $0xa0] sm:$0xff] %v1894_v28  ;;  %v1855_v59 = vmul.f32 0.6931472, %v2621_v31  ;;  %2630 = vlog2.f32 %v1801_v37 }
 0x51b   : > { %v1895_v38 = vsub.f32 %v3441_v8, %v1853_v29  ;;  %2632 = vlog2.f32 %v1803_v34 }
 0x51c   : > { %v2623_v39 = vpop.eup %2622  ;;  %v1896_v41 = vsub.f32 %v3446_v25, %v1855_v59 }
 0x51d   : > { %v2625_v40 = vpop.eup %2624  ;;  %1927 = vst [vmem:[#allocation12 + $0xa8] sm:$0xff] %v1895_v38  ;;  %v1857_v5 = vmul.f32 0.6931472, %v2623_v39  ;;  %v1805_v56 = vpop.xlane.xlu1 %1804 }
 0x51e   : > { %v1807_v44 = vpop.xlane.xlu0 %1806  ;;  %1928 = vst [vmem:[#allocation12 + $0xb0] sm:$0xff] %v1896_v41  ;;  %v1859_v63 = vmul.f32 0.6931472, %v2625_v40  ;;  %2634 = vlog2.f32 %v1805_v56 }
 0x51f   : > { %v1897_v45 = vsub.f32 %v3449_v58, %v1857_v5  ;;  %2636 = vlog2.f32 %v1807_v44 }
 0x520   : > { %v2627_v42 = vpop.eup %2626  ;;  %v1898_v46 = vsub.f32 %v3454_v61, %v1859_v63 }
 0x521   : > { %v2629_v47 = vpop.eup %2628  ;;  %1929 = vst [vmem:[#allocation12 + $0xb8] sm:$0xff] %v1897_v45  ;;  %v1861_v8 = vmul.f32 0.6931472, %v2627_v42  ;;  %v1809_v53 = vpop.xlane.xlu1 %1808 }
 0x522   : > { %1930 = vst [vmem:[#allocation12 + $0xc0] sm:$0xff] %v1898_v46  ;;  %v1863_v25 = vmul.f32 0.6931472, %v2629_v47  ;;  %2638 = vlog2.f32 %v1809_v53 }
 0x523   : > { %v1899_v48 = vsub.f32 %v3457_v32, %v1861_v8 }
 0x524   : > { %v2631_v26 = vpop.eup %2630  ;;  %v1900_v60 = vsub.f32 %v3462_v35, %v1863_v25 }
 0x525   : > { %v2633_v1 = vpop.eup %2632  ;;  %1931 = vst [vmem:[#allocation12 + $0xc8] sm:$0xff] %v1899_v48  ;;  %v1865_v54 = vmul.f32 0.6931472, %v2631_v26 }
 0x526   : > { %1932 = vst [vmem:[#allocation12 + $0xd0] sm:$0xff] %v1900_v60  ;;  %v1867_v58 = vmul.f32 0.6931472, %v2633_v1 }
 0x527   : > { %v1901_v2 = vsub.f32 %v3465_v50, %v1865_v54 }
 0x528   : > { %v2635_v61 = vpop.eup %2634  ;;  %v1902_v3 = vsub.f32 %v3470_v7, %v1867_v58 }
 0x529   : > { %v2637_v57 = vpop.eup %2636  ;;  %1933 = vst [vmem:[#allocation12 + $0xd8] sm:$0xff] %v1901_v2  ;;  %v1869_v4 = vmul.f32 0.6931472, %v2635_v61 }
 0x52a   : > { %1934 = vst [vmem:[#allocation12 + $0xe0] sm:$0xff] %v1902_v3  ;;  %v1871_v11 = vmul.f32 0.6931472, %v2637_v57 }
 0x52b   : > { %v1903_v32 = vsub.f32 %v3473_v19, %v1869_v4 }
 0x52c   : > { %v2639_v62 = vpop.eup %2638  ;;  %v1904_v35 = vsub.f32 %v3478_v9, %v1871_v11 }
 0x52d   : > { %1935 = vst [vmem:[#allocation12 + $0xe8] sm:$0xff] %v1903_v32  ;;  %v1873_v27 = vmul.f32 0.6931472, %v2639_v62 }
 0x52e   : > { %1936 = vst [vmem:[#allocation12 + $0xf0] sm:$0xff] %v1904_v35 }
 0x52f   : > { %v1905_v22 = vsub.f32 %v3481_v52, %v1873_v27 }
 0x531   : > { %1937 = vst [vmem:[#allocation12 + $0xf8] sm:$0xff] %v1905_v22 }
 0x532 PF: > { %p2411_p9 = scmp.eq.s32.totalorder %s2854_s22, 9  ;;  %s2810_s26 = smov [#allocation12]  }
 0x533   : > { %s1944_s29 = sshll.u32 %s2810_s26, 4  ;;  %s1945_s29 = int_to_ptr.vmem [resolvable:$true] %s1944_s29 }
 0x534   : > { %s2752_s7 = scalar_lea.vmem %s1945_s29, 4096  ;;  %p2759_p12 = scmp.lt.s32.totalorder %s1945_s29, %s1945_s29 }
 0x535   : > { %p2753_p2 = scmp.ne.s32.totalorder %s1945_s29, %s2752_s7  ;;  %p2760_p13 = scmp.lt.s32.totalorder %s2752_s7, %s2752_s7 }
 0x537   : > { %p2754_p10 = pnand %p2753_p2, %p2411_p9  ;;  %p2761_p0 = por %p2760_p13, %p2759_p12 }
 0x539   : > { %p2755_p11 = pneg %p2754_p10 }
 0x53b   : > { %p2762_p8 = pnand %p2761_p0, %p2755_p11 }
 0x53d   : > { %2765 = shalt.err (!%p2762_p8)
}
 0x53e   : > { %s2766_s10 = scalar_lea.hbm %s3549_s6, 4096 }
 0x53f   : > { %p2767_p3 = scmp.ne.s32.totalorder %s3549_s6, %s2766_s10  ;;  %p2772_p6 = scmp.lt.u32.totalorder %s2766_s10, %s3549_s6 }
 0x541   : > { %p2768_p4 = pnand %p2767_p3, %p2411_p9 }
 0x543   : > { %p2769_p1 = pneg %p2768_p4 }
 0x545   : > { %p2774_p5 = pnand %p2772_p6, %p2769_p1 }
 0x547   : > { %2777 = shalt.err (!%p2774_p5)
}
 0x548   : > { %s2811_s15 = smov 128   ;;  %s2812_s16 = smov 8  }
 0x549   : > { %2387 = dma.vmem_to_hbm [thread:$0]  (%p2411_p9), %s1945_s29, 4096, %s3549_s6, [#allocation6], %s2811_s15, %s2811_s15, %s2812_s16  }
 0x54a   : > { %2795 = dma.done.wait (%p2411_p9), [#allocation6], 4096  }
 0x54b   : > { %2797 = vsyncadd (%p2411_p9), [#allocation6], 4294963200 }
 0x54c PF: > { %s20_s21 = sadd.s32 1, %s2800_s21  }
 0x54d   : > { %p17_p7 = scmp.ge.s32.totalorder %s20_s21, 12  }
 0x54f   :  { %19 = sbr.rel (!%p17_p7) target bundleno = 4 (0x4), region = 93 }
 0x556   :  { %1960 = vsyncpa [#allocation5], 1 }
 0x557   :  { %1962 = vsyncpa [#allocation5 + $0x1], 1 }
 0x558   :  { %1963 = vsyncpa [#allocation8], 1 }
 0x559   :  { %1964 = vsyncpa [#allocation11], 1 }
 0x55a   :  { %1965 = vsyncpa [#allocation6], 1 }
 0x55b   :  { %1967 = vsyncpa [#allocation6 + $0x1], 1 }

</bundles_post_ra>
